<compile_context>
chip_gen: v7x
topology: tpu7x:2x2x1
jax: 0.10.0
libtpu: 0.0.40
codegen_flags: <defaults>
</compile_context>

<pallas_src>
import math

import jax
import jax.numpy as jnp
from jax import lax
from jax.experimental import pallas as pl
from jax.experimental.pallas import tpu as pltpu

# ---- small synthetic ViT config (shapes implied by the module) ----
BATCH = 2
IN_CHANS = 3
IMG_SIZE = 16
PATCH = 8
EMBED_DIM = 32
NUM_HEADS = 2
MLP_DIM = 4 * EMBED_DIM
DEPTH = 3                       # featurizer has DEPTH blocks; output after block DEPTH-2
NUM_BLOCKS_RUN = DEPTH - 1      # blocks actually executed
LN_EPS = 1e-6                   # timm ViT LayerNorm eps
NUM_PATCHES = (IMG_SIZE // PATCH) ** 2
SEQ = NUM_PATCHES + 1           # +1 cls token
T_PAD = 8                       # SEQ padded to the 8-sublane tile
PATCH_DIM = IN_CHANS * PATCH * PATCH
HEAD_DIM = EMBED_DIM // NUM_HEADS
VEC_LANES = 128                 # lane width of the packed per-block vector slab (>= MLP_DIM, >= 3D)


# --------------------------------------------------------------------------
# In-kernel helpers
# --------------------------------------------------------------------------
def _layernorm(x, w, b):
    mu = jnp.mean(x, axis=-1, keepdims=True)
    var = jnp.mean(jnp.square(x - mu), axis=-1, keepdims=True)
    return (x - mu) * jax.lax.rsqrt(var + LN_EPS) * w + b


def _gelu_exact(x):
    # nn.GELU() (erf-based), matching timm's default act_layer
    return 0.5 * x * (1.0 + jax.lax.erf(x * (1.0 / math.sqrt(2.0))))


def _bf(x):
    return x.astype(jnp.bfloat16)


# --------------------------------------------------------------------------
# Fused ViT forward kernel: one grid step = one batch element, all blocks inside
# --------------------------------------------------------------------------
def _fused_vit_kernel(patches_ref, pw_ref, eadd_ref,
                      vecs_ref, wa_ref, fc1_ref, fc2_ref,
                      out_ref):
    scale = HEAD_DIM ** -0.5

    # ---- patch-embed matmul; cls token / patch bias / pos_embed pre-folded
    #      into the additive slab eadd_ref ----
    x = jnp.dot(_bf(patches_ref[...]), pw_ref[...],
                preferred_element_type=jnp.float32) + eadd_ref[...]        # (T_PAD, D) f32

    # padded key positions (rows >= SEQ) never influence real tokens
    key_valid = jax.lax.broadcasted_iota(
        jnp.int32, (NUM_HEADS, T_PAD, T_PAD), 2) < SEQ

    def block_step(blk, x):
        vec = vecs_ref[blk]            # (8, 128) f32: LN params + all biases
        wa = wa_ref[blk]               # (D, 4D) bf16: [qkv_w | proj_w]
        fc1_w = fc1_ref[blk]           # (D, MLP_DIM) bf16
        fc2_w = fc2_ref[blk]           # (MLP_DIM, D) bf16

        ln1_w = vec[0:1, :EMBED_DIM]
        ln1_b = vec[1:2, :EMBED_DIM]
        qkv_b = vec[2:3, :3 * EMBED_DIM]
        proj_b = vec[3:4, :EMBED_DIM]
        ln2_w = vec[4:5, :EMBED_DIM]
        ln2_b = vec[5:6, :EMBED_DIM]
        fc1_b = vec[6:7, :MLP_DIM]
        fc2_b = vec[7:8, :EMBED_DIM]

        # ---------- attention branch: x = x + proj(MHSA(LN1(x))) ----------
        h = _bf(_layernorm(x, ln1_w, ln1_b))                               # single bf16 cast
        qkv = jnp.dot(h, wa[:, :3 * EMBED_DIM],
                      preferred_element_type=jnp.float32) + qkv_b          # (T_PAD, 3D)

        q = qkv[:, 0:EMBED_DIM] * scale
        k = qkv[:, EMBED_DIM:2 * EMBED_DIM]
        v = qkv[:, 2 * EMBED_DIM:3 * EMBED_DIM]

        # head-major (H, T, dh) for batched MXU einsums (no per-head Python loop)
        q3 = jnp.transpose(q.reshape(T_PAD, NUM_HEADS, HEAD_DIM), (1, 0, 2))
        k3 = jnp.transpose(k.reshape(T_PAD, NUM_HEADS, HEAD_DIM), (1, 0, 2))
        v3 = jnp.transpose(v.reshape(T_PAD, NUM_HEADS, HEAD_DIM), (1, 0, 2))

        s = jnp.einsum('hqd,hkd->hqk', _bf(q3), _bf(k3),
                       preferred_element_type=jnp.float32)                 # (H, T, T)
        s = jnp.where(key_valid, s, -1e30)
        s = s - jnp.max(s, axis=-1, keepdims=True)
        p = jnp.exp(s)
        p = p * pl.reciprocal(jnp.sum(p, axis=-1, keepdims=True), approx=True)
        o = jnp.einsum('hqk,hkd->hqd', _bf(p), _bf(v3),
                       preferred_element_type=jnp.float32)                 # (H, T, dh)
        attn = jnp.transpose(o, (1, 0, 2)).reshape(T_PAD, EMBED_DIM)

        x = x + jnp.dot(_bf(attn), wa[:, 3 * EMBED_DIM:],
                        preferred_element_type=jnp.float32) + proj_b

        # ---------- MLP branch: x = x + fc2(gelu(fc1(LN2(x)))) ----------
        h2 = _bf(_layernorm(x, ln2_w, ln2_b))
        m = _gelu_exact(jnp.dot(h2, fc1_w,
                                preferred_element_type=jnp.float32) + fc1_b)
        x = x + jnp.dot(_bf(m), fc2_w,
                        preferred_element_type=jnp.float32) + fc2_b
        return x

    x = lax.fori_loop(0, NUM_BLOCKS_RUN, block_step, x, unroll=True)
    out_ref[...] = x


# --------------------------------------------------------------------------
# Host-side weight packing
# --------------------------------------------------------------------------
def _pack_featurizer(params):
    """Pack per-block weights into 4 stacked operands along a leading
    (NUM_BLOCKS_RUN) axis: one (8, 128) f32 vector slab (LN params + biases)
    and three bf16 matrices.  All are VMEM-resident for the whole kernel and
    DMA'd only once (constant BlockSpec index)."""
    blks = params['blocks'][:NUM_BLOCKS_RUN]
    bf = jnp.bfloat16

    def row(v):
        v = v.reshape(1, -1).astype(jnp.float32)
        return jnp.pad(v, ((0, 0), (0, VEC_LANES - v.shape[1])))

    vecs, was, fc1s, fc2s = [], [], [], []
    for b in blks:
        vecs.append(jnp.concatenate([
            row(b['ln1_w']), row(b['ln1_b']),
            row(b['qkv_b']), row(b['proj_b']),
            row(b['ln2_w']), row(b['ln2_b']),
            row(b['fc1_b']), row(b['fc2_b'])], axis=0))                    # (8, 128)
        # fused qkv (D, 3D) kept as-is (timm q|k|v column layout), proj appended
        was.append(jnp.concatenate([b['qkv_w'], b['proj_w']], axis=1).astype(bf))  # (D, 4D)
        fc1s.append(b['fc1_w'].astype(bf))                                 # (D, MLP_DIM)
        fc2s.append(b['fc2_w'].astype(bf))                                 # (MLP_DIM, D)

    return (jnp.stack(vecs, axis=0), jnp.stack(was, axis=0),
            jnp.stack(fc1s, axis=0), jnp.stack(fc2s, axis=0))


# --------------------------------------------------------------------------
# Host wrapper
# --------------------------------------------------------------------------
def timm_vit_backbone_forward(pixel_values, params):
    B = pixel_values.shape[0]
    Hp = Wp = IMG_SIZE // PATCH

    # Conv2d(kernel=stride=PATCH) realised as patch-flatten (host-side layout
    # plumbing) + matmul inside the fused kernel.
    x = pixel_values.reshape(B, IN_CHANS, Hp, PATCH, Wp, PATCH)
    patches = jnp.transpose(x, (0, 2, 4, 1, 3, 5)).reshape(B, NUM_PATCHES, PATCH_DIM)
    # row 0 reserved for cls token, rows SEQ..T_PAD are sublane padding (zeros)
    patches_pad = jnp.pad(patches, ((0, 0), (1, T_PAD - SEQ), (0, 0)))     # (B, T_PAD, PATCH_DIM)

    patch_w = params['patch_w'].astype(jnp.bfloat16)                       # (PATCH_DIM, D)

    # Fold cls token, patch-embed bias and pos_embed into one additive slab.
    pos_pad = jnp.pad(params['pos_embed'], ((0, T_PAD - SEQ), (0, 0)))     # (T_PAD, D)
    bias_rows = jnp.concatenate([
        params['cls_token'],
        jnp.broadcast_to(params['patch_b'], (NUM_PATCHES, EMBED_DIM)),
        jnp.zeros((T_PAD - SEQ, EMBED_DIM), jnp.float32)], axis=0)
    embed_add = (pos_pad + bias_rows).astype(jnp.float32)                  # (T_PAD, D)

    blk_vecs, blk_wa, blk_fc1, blk_fc2 = _pack_featurizer(params)

    per_b3 = lambda b: (b, 0, 0)     # per-batch-element activation blocks
    const2 = lambda b: (0, 0)        # shared 2-D operands (fetched once)
    const3 = lambda b: (0, 0, 0)     # stacked per-block weights (fetched once)

    out = pl.pallas_call(
        _fused_vit_kernel,
        grid=(B,),
        in_specs=[
            pl.BlockSpec((None, T_PAD, PATCH_DIM), per_b3),
            pl.BlockSpec(patch_w.shape, const2),
            pl.BlockSpec(embed_add.shape, const2),
            pl.BlockSpec(blk_vecs.shape, const3),
            pl.BlockSpec(blk_wa.shape, const3),
            pl.BlockSpec(blk_fc1.shape, const3),
            pl.BlockSpec(blk_fc2.shape, const3),
        ],
        out_specs=pl.BlockSpec((None, T_PAD, EMBED_DIM), per_b3),
        out_shape=jax.ShapeDtypeStruct((B, T_PAD, EMBED_DIM), jnp.float32),
        compiler_params=pltpu.CompilerParams(
            dimension_semantics=("parallel",)),
    )(patches_pad, patch_w, embed_add, blk_vecs, blk_wa, blk_fc1, blk_fc2)

    # get_intermediate_layers(n={DEPTH-2}): output after block DEPTH-2, no final
    # norm, prefix (cls) token dropped; also drop the sublane padding rows.
    return out[:, 1:SEQ, :]


# --------------------------------------------------------------------------
# Deterministic parameter init (synthetic; no checkpoint loading)
# --------------------------------------------------------------------------
def init_params(key):
    ks = jax.random.split(key, 3 + DEPTH)
    std = 0.02
    params = {
        'patch_w': std * jax.random.normal(ks[0], (PATCH_DIM, EMBED_DIM), jnp.float32),
        'patch_b': jnp.zeros((1, EMBED_DIM), jnp.float32),
        'cls_token': std * jax.random.normal(ks[1], (1, EMBED_DIM), jnp.float32),
        'pos_embed': std * jax.random.normal(ks[2], (SEQ, EMBED_DIM), jnp.float32),
        'blocks': [],
    }
    for d in range(DEPTH):
        bk = jax.random.split(ks[3 + d], 4)
        params['blocks'].append({
            'ln1_w': jnp.ones((1, EMBED_DIM), jnp.float32),
            'ln1_b': jnp.zeros((1, EMBED_DIM), jnp.float32),
            # timm fused qkv column layout: q | k | v contiguous, heads contiguous within each
            'qkv_w': std * jax.random.normal(bk[0], (EMBED_DIM, 3 * EMBED_DIM), jnp.float32),
            'qkv_b': jnp.zeros((1, 3 * EMBED_DIM), jnp.float32),
            'proj_w': std * jax.random.normal(bk[1], (EMBED_DIM, EMBED_DIM), jnp.float32),
            'proj_b': jnp.zeros((1, EMBED_DIM), jnp.float32),
            'ln2_w': jnp.ones((1, EMBED_DIM), jnp.float32),
            'ln2_b': jnp.zeros((1, EMBED_DIM), jnp.float32),
            'fc1_w': std * jax.random.normal(bk[2], (EMBED_DIM, MLP_DIM), jnp.float32),
            'fc1_b': jnp.zeros((1, MLP_DIM), jnp.float32),
            'fc2_w': std * jax.random.normal(bk[3], (MLP_DIM, EMBED_DIM), jnp.float32),
            'fc2_b': jnp.zeros((1, EMBED_DIM), jnp.float32),
        })
    return params


if __name__ == "__main__":
    key = jax.random.PRNGKey(0)
    pkey, xkey = jax.random.split(key)
    params = init_params(pkey)
    pixel_values = jax.random.normal(xkey, (BATCH, IN_CHANS, IMG_SIZE, IMG_SIZE), jnp.float32)

    fwd = jax.jit(timm_vit_backbone_forward)
    out = jax.block_until_ready(fwd(pixel_values, params))
    assert out.shape == (BATCH, NUM_PATCHES, EMBED_DIM), out.shape
    assert bool(jnp.all(jnp.isfinite(out)))
    print("KERNEL_OK")
</pallas_src>

<mosaic_0001>
module attributes {stable_mosaic.version = 11 : i64} {
  func.func @_fused_vit_kernel(%arg0: i32, %arg1: memref<1x8x192xf32, #tpu.memory_space<vmem>>, %arg2: memref<192x32xbf16, #tpu.memory_space<vmem>>, %arg3: memref<8x32xf32, #tpu.memory_space<vmem>>, %arg4: memref<2x8x128xf32, #tpu.memory_space<vmem>>, %arg5: memref<2x32x128xbf16, #tpu.memory_space<vmem>>, %arg6: memref<2x32x128xbf16, #tpu.memory_space<vmem>>, %arg7: memref<2x128x32xbf16, #tpu.memory_space<vmem>>, %arg8: memref<1x8x32xf32, #tpu.memory_space<vmem>>) attributes {dimension_semantics = [#tpu.dimension_semantics<parallel>], iteration_bounds = array<i64: 2>, scalar_prefetch = 0 : i64, scratch_operands = 0 : i64, tpu.core_type = #tpu.core_type<tc>, window_params = [{transform_indices = @transform_0, window_bounds = array<i64: 1, 8, 192>}, {pipeline_mode = #tpu.pipeline_mode<synchronous>, transform_indices = @transform_1, window_bounds = array<i64: 192, 32>}, {pipeline_mode = #tpu.pipeline_mode<synchronous>, transform_indices = @transform_2, window_bounds = array<i64: 8, 32>}, {pipeline_mode = #tpu.pipeline_mode<synchronous>, transform_indices = @transform_3, window_bounds = array<i64: 2, 8, 128>}, {pipeline_mode = #tpu.pipeline_mode<synchronous>, transform_indices = @transform_4, window_bounds = array<i64: 2, 32, 128>}, {pipeline_mode = #tpu.pipeline_mode<synchronous>, transform_indices = @transform_5, window_bounds = array<i64: 2, 32, 128>}, {pipeline_mode = #tpu.pipeline_mode<synchronous>, transform_indices = @transform_6, window_bounds = array<i64: 2, 128, 32>}, {transform_indices = @transform_7, window_bounds = array<i64: 1, 8, 32>}]} {
    %c0 = arith.constant 0 : index
    %c0_0 = arith.constant 0 : index
    %c0_1 = arith.constant 0 : index
    %0 = vector.load %arg1[%c0, %c0_0, %c0_1] : memref<1x8x192xf32, #tpu.memory_space<vmem>>, vector<1x8x192xf32>
    %1 = vector.shape_cast %0 : vector<1x8x192xf32> to vector<8x192xf32>
    %2 = arith.truncf %1 : vector<8x192xf32> to vector<8x192xbf16>
    %c0_2 = arith.constant 0 : index
    %c0_3 = arith.constant 0 : index
    %3 = vector.load %arg2[%c0_2, %c0_3] : memref<192x32xbf16, #tpu.memory_space<vmem>>, vector<192x32xbf16>
    %cst = arith.constant dense<0.000000e+00> : vector<8x32xf32>
    %4 = tpu.matmul %2, %3, %cst {dimension_numbers = #tpu.dot_dimension_numbers<[1], [0], [0], [1], [0, 0, 1, 1], [], []>} : vector<8x192xbf16>, vector<192x32xbf16>, vector<8x32xf32> -> vector<8x32xf32>
    %c0_4 = arith.constant 0 : index
    %c0_5 = arith.constant 0 : index
    %5 = vector.load %arg3[%c0_4, %c0_5] : memref<8x32xf32, #tpu.memory_space<vmem>>, vector<8x32xf32>
    %6 = arith.addf %4, %5 : vector<8x32xf32>
    %7 = tpu.iota {dimensions = array<i32: 2>} : vector<2x8x8xi32>
    %c5_i32 = arith.constant 5 : i32
    %8 = vector.broadcast %c5_i32 : i32 to vector<2x8x8xi32>
    %9 = arith.cmpi slt, %7, %8 : vector<2x8x8xi32>
    %c0_i32 = arith.constant 0 : i32
    %10 = arith.index_cast %c0_i32 : i32 to index
    %c0_6 = arith.constant 0 : index
    %c0_7 = arith.constant 0 : index
    %11 = vector.load %arg4[%10, %c0_6, %c0_7] : memref<2x8x128xf32, #tpu.memory_space<vmem>>, vector<1x8x128xf32>
    %12 = vector.shape_cast %11 : vector<1x8x128xf32> to vector<8x128xf32>
    %13 = arith.index_cast %c0_i32 : i32 to index
    %c0_8 = arith.constant 0 : index
    %c0_9 = arith.constant 0 : index
    %14 = vector.load %arg5[%13, %c0_8, %c0_9] : memref<2x32x128xbf16, #tpu.memory_space<vmem>>, vector<1x32x128xbf16>
    %15 = vector.shape_cast %14 : vector<1x32x128xbf16> to vector<32x128xbf16>
    %16 = arith.index_cast %c0_i32 : i32 to index
    %c0_10 = arith.constant 0 : index
    %c0_11 = arith.constant 0 : index
    %17 = vector.load %arg6[%16, %c0_10, %c0_11] : memref<2x32x128xbf16, #tpu.memory_space<vmem>>, vector<1x32x128xbf16>
    %18 = vector.shape_cast %17 : vector<1x32x128xbf16> to vector<32x128xbf16>
    %19 = arith.index_cast %c0_i32 : i32 to index
    %c0_12 = arith.constant 0 : index
    %c0_13 = arith.constant 0 : index
    %20 = vector.load %arg7[%19, %c0_12, %c0_13] : memref<2x128x32xbf16, #tpu.memory_space<vmem>>, vector<1x128x32xbf16>
    %21 = vector.shape_cast %20 : vector<1x128x32xbf16> to vector<128x32xbf16>
    %22 = vector.extract_strided_slice %12 {offsets = [0, 0], sizes = [1, 32], strides = [1, 1]} : vector<8x128xf32> to vector<1x32xf32>
    %23 = vector.extract_strided_slice %12 {offsets = [1, 0], sizes = [1, 32], strides = [1, 1]} : vector<8x128xf32> to vector<1x32xf32>
    %24 = vector.extract_strided_slice %12 {offsets = [2, 0], sizes = [1, 96], strides = [1, 1]} : vector<8x128xf32> to vector<1x96xf32>
    %25 = vector.extract_strided_slice %12 {offsets = [3, 0], sizes = [1, 32], strides = [1, 1]} : vector<8x128xf32> to vector<1x32xf32>
    %26 = vector.extract_strided_slice %12 {offsets = [4, 0], sizes = [1, 32], strides = [1, 1]} : vector<8x128xf32> to vector<1x32xf32>
    %27 = vector.extract_strided_slice %12 {offsets = [5, 0], sizes = [1, 32], strides = [1, 1]} : vector<8x128xf32> to vector<1x32xf32>
    %28 = vector.extract_strided_slice %12 {offsets = [6, 0], sizes = [1, 128], strides = [1, 1]} : vector<8x128xf32> to vector<1x128xf32>
    %29 = vector.extract_strided_slice %12 {offsets = [7, 0], sizes = [1, 32], strides = [1, 1]} : vector<8x128xf32> to vector<1x32xf32>
    %cst_14 = arith.constant dense<0.000000e+00> : vector<8xf32>
    %30 = vector.multi_reduction <add>, %6, %cst_14 [1] : vector<8x32xf32> to vector<8xf32>
    %31 = vector.shape_cast %30 : vector<8xf32> to vector<8x1xf32>
    %cst_15 = arith.constant 3.200000e+01 : f32
    %32 = vector.broadcast %cst_15 : f32 to vector<8x1xf32>
    %33 = arith.divf %31, %32 : vector<8x1xf32>
    %34 = vector.broadcast %33 : vector<8x1xf32> to vector<8x32xf32>
    %35 = arith.subf %6, %34 : vector<8x32xf32>
    %36 = arith.mulf %35, %35 : vector<8x32xf32>
    %cst_16 = arith.constant dense<0.000000e+00> : vector<8xf32>
    %37 = vector.multi_reduction <add>, %36, %cst_16 [1] : vector<8x32xf32> to vector<8xf32>
    %38 = vector.shape_cast %37 : vector<8xf32> to vector<8x1xf32>
    %cst_17 = arith.constant 3.200000e+01 : f32
    %39 = vector.broadcast %cst_17 : f32 to vector<8x1xf32>
    %40 = arith.divf %38, %39 : vector<8x1xf32>
    %41 = vector.broadcast %33 : vector<8x1xf32> to vector<8x32xf32>
    %42 = arith.subf %6, %41 : vector<8x32xf32>
    %cst_18 = arith.constant 9.99999997E-7 : f32
    %43 = vector.broadcast %cst_18 : f32 to vector<8x1xf32>
    %44 = arith.addf %40, %43 : vector<8x1xf32>
    %45 = math.rsqrt %44 : vector<8x1xf32>
    %46 = vector.broadcast %45 : vector<8x1xf32> to vector<8x32xf32>
    %47 = arith.mulf %42, %46 : vector<8x32xf32>
    %48 = vector.broadcast %22 : vector<1x32xf32> to vector<8x32xf32>
    %49 = arith.mulf %47, %48 : vector<8x32xf32>
    %50 = vector.broadcast %23 : vector<1x32xf32> to vector<8x32xf32>
    %51 = arith.addf %49, %50 : vector<8x32xf32>
    %52 = arith.truncf %51 : vector<8x32xf32> to vector<8x32xbf16>
    %53 = vector.extract_strided_slice %15 {offsets = [0, 0], sizes = [32, 96], strides = [1, 1]} : vector<32x128xbf16> to vector<32x96xbf16>
    %cst_19 = arith.constant dense<0.000000e+00> : vector<8x96xf32>
    %54 = tpu.matmul %52, %53, %cst_19 {dimension_numbers = #tpu.dot_dimension_numbers<[1], [0], [0], [1], [0, 0, 1, 1], [], []>} : vector<8x32xbf16>, vector<32x96xbf16>, vector<8x96xf32> -> vector<8x96xf32>
    %55 = vector.broadcast %24 : vector<1x96xf32> to vector<8x96xf32>
    %56 = arith.addf %54, %55 : vector<8x96xf32>
    %57 = vector.extract_strided_slice %56 {offsets = [0, 0], sizes = [8, 32], strides = [1, 1]} : vector<8x96xf32> to vector<8x32xf32>
    %cst_20 = arith.constant 2.500000e-01 : f32
    %58 = vector.broadcast %cst_20 : f32 to vector<8x32xf32>
    %59 = arith.mulf %57, %58 : vector<8x32xf32>
    %60 = vector.extract_strided_slice %56 {offsets = [0, 32], sizes = [8, 32], strides = [1, 1]} : vector<8x96xf32> to vector<8x32xf32>
    %61 = vector.extract_strided_slice %56 {offsets = [0, 64], sizes = [8, 32], strides = [1, 1]} : vector<8x96xf32> to vector<8x32xf32>
    %62 = vector.shape_cast %59 : vector<8x32xf32> to vector<8x2x16xf32>
    %63 = tpu.transpose %62, [1, 0, 2] : vector<8x2x16xf32> -> vector<2x8x16xf32>
    %64 = vector.shape_cast %60 : vector<8x32xf32> to vector<8x2x16xf32>
    %65 = tpu.transpose %64, [1, 0, 2] : vector<8x2x16xf32> -> vector<2x8x16xf32>
    %66 = vector.shape_cast %61 : vector<8x32xf32> to vector<8x2x16xf32>
    %67 = tpu.transpose %66, [1, 0, 2] : vector<8x2x16xf32> -> vector<2x8x16xf32>
    %68 = arith.truncf %63 : vector<2x8x16xf32> to vector<2x8x16xbf16>
    %69 = arith.truncf %65 : vector<2x8x16xf32> to vector<2x8x16xbf16>
    "tpu.trace_start"() <{level = 10 : i32, message = "hqd,hkd->hqk"}> : () -> ()
    %cst_21 = arith.constant dense<0.000000e+00> : vector<2x8x8xf32>
    %70 = tpu.matmul %68, %69, %cst_21 {dimension_numbers = #tpu.dot_dimension_numbers<[2], [2], [1], [1], [0, 0, 0, 1, 1, 1], [0], [0]>} : vector<2x8x16xbf16>, vector<2x8x16xbf16>, vector<2x8x8xf32> -> vector<2x8x8xf32>
    %cst_22 = arith.constant -1.000000e+30 : f32
    "tpu.trace_stop"() : () -> ()
    %71 = vector.broadcast %cst_22 : f32 to vector<2x8x8xf32>
    %72 = arith.select %9, %70, %71 : vector<2x8x8xi1>, vector<2x8x8xf32>
    %cst_23 = arith.constant dense<0xFF800000> : vector<2x8xf32>
    %73 = vector.multi_reduction <maximumf>, %72, %cst_23 [2] : vector<2x8x8xf32> to vector<2x8xf32>
    %74 = vector.shape_cast %73 : vector<2x8xf32> to vector<2x8x1xf32>
    %75 = vector.broadcast %74 : vector<2x8x1xf32> to vector<2x8x8xf32>
    %76 = arith.subf %72, %75 : vector<2x8x8xf32>
    %77 = math.exp %76 : vector<2x8x8xf32>
    %cst_24 = arith.constant dense<0.000000e+00> : vector<2x8xf32>
    %78 = vector.multi_reduction <add>, %77, %cst_24 [2] : vector<2x8x8xf32> to vector<2x8xf32>
    %79 = vector.shape_cast %78 : vector<2x8xf32> to vector<2x8x1xf32>
    %80 = tpu.reciprocal %79 {approx = true} : vector<2x8x1xf32> -> vector<2x8x1xf32>
    %81 = vector.broadcast %80 : vector<2x8x1xf32> to vector<2x8x8xf32>
    %82 = arith.mulf %77, %81 : vector<2x8x8xf32>
    %83 = arith.truncf %82 : vector<2x8x8xf32> to vector<2x8x8xbf16>
    %84 = arith.truncf %67 : vector<2x8x16xf32> to vector<2x8x16xbf16>
    "tpu.trace_start"() <{level = 10 : i32, message = "hqk,hkd->hqd"}> : () -> ()
    %cst_25 = arith.constant dense<0.000000e+00> : vector<2x8x16xf32>
    %85 = tpu.matmul %83, %84, %cst_25 {dimension_numbers = #tpu.dot_dimension_numbers<[2], [1], [1], [2], [0, 0, 0, 1, 1, 2], [0], [0]>} : vector<2x8x8xbf16>, vector<2x8x16xbf16>, vector<2x8x16xf32> -> vector<2x8x16xf32>
    "tpu.trace_stop"() : () -> ()
    %86 = tpu.transpose %85, [1, 0, 2] : vector<2x8x16xf32> -> vector<8x2x16xf32>
    %87 = vector.shape_cast %86 : vector<8x2x16xf32> to vector<8x32xf32>
    %88 = arith.truncf %87 : vector<8x32xf32> to vector<8x32xbf16>
    %89 = vector.extract_strided_slice %15 {offsets = [0, 96], sizes = [32, 32], strides = [1, 1]} : vector<32x128xbf16> to vector<32x32xbf16>
    %cst_26 = arith.constant dense<0.000000e+00> : vector<8x32xf32>
    %90 = tpu.matmul %88, %89, %cst_26 {dimension_numbers = #tpu.dot_dimension_numbers<[1], [0], [0], [1], [0, 0, 1, 1], [], []>} : vector<8x32xbf16>, vector<32x32xbf16>, vector<8x32xf32> -> vector<8x32xf32>
    %91 = arith.addf %6, %90 : vector<8x32xf32>
    %92 = vector.broadcast %25 : vector<1x32xf32> to vector<8x32xf32>
    %93 = arith.addf %91, %92 : vector<8x32xf32>
    %cst_27 = arith.constant dense<0.000000e+00> : vector<8xf32>
    %94 = vector.multi_reduction <add>, %93, %cst_27 [1] : vector<8x32xf32> to vector<8xf32>
    %95 = vector.shape_cast %94 : vector<8xf32> to vector<8x1xf32>
    %cst_28 = arith.constant 3.200000e+01 : f32
    %96 = vector.broadcast %cst_28 : f32 to vector<8x1xf32>
    %97 = arith.divf %95, %96 : vector<8x1xf32>
    %98 = vector.broadcast %97 : vector<8x1xf32> to vector<8x32xf32>
    %99 = arith.subf %93, %98 : vector<8x32xf32>
    %100 = arith.mulf %99, %99 : vector<8x32xf32>
    %cst_29 = arith.constant dense<0.000000e+00> : vector<8xf32>
    %101 = vector.multi_reduction <add>, %100, %cst_29 [1] : vector<8x32xf32> to vector<8xf32>
    %102 = vector.shape_cast %101 : vector<8xf32> to vector<8x1xf32>
    %cst_30 = arith.constant 3.200000e+01 : f32
    %103 = vector.broadcast %cst_30 : f32 to vector<8x1xf32>
    %104 = arith.divf %102, %103 : vector<8x1xf32>
    %105 = vector.broadcast %97 : vector<8x1xf32> to vector<8x32xf32>
    %106 = arith.subf %93, %105 : vector<8x32xf32>
    %cst_31 = arith.constant 9.99999997E-7 : f32
    %107 = vector.broadcast %cst_31 : f32 to vector<8x1xf32>
    %108 = arith.addf %104, %107 : vector<8x1xf32>
    %109 = math.rsqrt %108 : vector<8x1xf32>
    %110 = vector.broadcast %109 : vector<8x1xf32> to vector<8x32xf32>
    %111 = arith.mulf %106, %110 : vector<8x32xf32>
    %112 = vector.broadcast %26 : vector<1x32xf32> to vector<8x32xf32>
    %113 = arith.mulf %111, %112 : vector<8x32xf32>
    %114 = vector.broadcast %27 : vector<1x32xf32> to vector<8x32xf32>
    %115 = arith.addf %113, %114 : vector<8x32xf32>
    %116 = arith.truncf %115 : vector<8x32xf32> to vector<8x32xbf16>
    %cst_32 = arith.constant dense<0.000000e+00> : vector<8x128xf32>
    %117 = tpu.matmul %116, %18, %cst_32 {dimension_numbers = #tpu.dot_dimension_numbers<[1], [0], [0], [1], [0, 0, 1, 1], [], []>} : vector<8x32xbf16>, vector<32x128xbf16>, vector<8x128xf32> -> vector<8x128xf32>
    %118 = vector.broadcast %28 : vector<1x128xf32> to vector<8x128xf32>
    %119 = arith.addf %117, %118 : vector<8x128xf32>
    %cst_33 = arith.constant 5.000000e-01 : f32
    %120 = vector.broadcast %cst_33 : f32 to vector<8x128xf32>
    %121 = arith.mulf %120, %119 : vector<8x128xf32>
    %cst_34 = arith.constant 0.707106769 : f32
    %122 = vector.broadcast %cst_34 : f32 to vector<8x128xf32>
    %123 = arith.mulf %119, %122 : vector<8x128xf32>
    %124 = math.erf %123 : vector<8x128xf32>
    %cst_35 = arith.constant 1.000000e+00 : f32
    %125 = vector.broadcast %cst_35 : f32 to vector<8x128xf32>
    %126 = arith.addf %125, %124 : vector<8x128xf32>
    %127 = arith.mulf %121, %126 : vector<8x128xf32>
    %128 = arith.truncf %127 : vector<8x128xf32> to vector<8x128xbf16>
    %cst_36 = arith.constant dense<0.000000e+00> : vector<8x32xf32>
    %129 = tpu.matmul %128, %21, %cst_36 {dimension_numbers = #tpu.dot_dimension_numbers<[1], [0], [0], [1], [0, 0, 1, 1], [], []>} : vector<8x128xbf16>, vector<128x32xbf16>, vector<8x32xf32> -> vector<8x32xf32>
    %130 = arith.addf %93, %129 : vector<8x32xf32>
    %131 = vector.broadcast %29 : vector<1x32xf32> to vector<8x32xf32>
    %132 = arith.addf %130, %131 : vector<8x32xf32>
    %c1_i32 = arith.constant 1 : i32
    %133 = arith.index_cast %c1_i32 : i32 to index
    %c0_37 = arith.constant 0 : index
    %c0_38 = arith.constant 0 : index
    %134 = vector.load %arg4[%133, %c0_37, %c0_38] : memref<2x8x128xf32, #tpu.memory_space<vmem>>, vector<1x8x128xf32>
    %135 = vector.shape_cast %134 : vector<1x8x128xf32> to vector<8x128xf32>
    %136 = arith.index_cast %c1_i32 : i32 to index
    %c0_39 = arith.constant 0 : index
    %c0_40 = arith.constant 0 : index
    %137 = vector.load %arg5[%136, %c0_39, %c0_40] : memref<2x32x128xbf16, #tpu.memory_space<vmem>>, vector<1x32x128xbf16>
    %138 = vector.shape_cast %137 : vector<1x32x128xbf16> to vector<32x128xbf16>
    %139 = arith.index_cast %c1_i32 : i32 to index
    %c0_41 = arith.constant 0 : index
    %c0_42 = arith.constant 0 : index
    %140 = vector.load %arg6[%139, %c0_41, %c0_42] : memref<2x32x128xbf16, #tpu.memory_space<vmem>>, vector<1x32x128xbf16>
    %141 = vector.shape_cast %140 : vector<1x32x128xbf16> to vector<32x128xbf16>
    %142 = arith.index_cast %c1_i32 : i32 to index
    %c0_43 = arith.constant 0 : index
    %c0_44 = arith.constant 0 : index
    %143 = vector.load %arg7[%142, %c0_43, %c0_44] : memref<2x128x32xbf16, #tpu.memory_space<vmem>>, vector<1x128x32xbf16>
    %144 = vector.shape_cast %143 : vector<1x128x32xbf16> to vector<128x32xbf16>
    %145 = vector.extract_strided_slice %135 {offsets = [0, 0], sizes = [1, 32], strides = [1, 1]} : vector<8x128xf32> to vector<1x32xf32>
    %146 = vector.extract_strided_slice %135 {offsets = [1, 0], sizes = [1, 32], strides = [1, 1]} : vector<8x128xf32> to vector<1x32xf32>
    %147 = vector.extract_strided_slice %135 {offsets = [2, 0], sizes = [1, 96], strides = [1, 1]} : vector<8x128xf32> to vector<1x96xf32>
    %148 = vector.extract_strided_slice %135 {offsets = [3, 0], sizes = [1, 32], strides = [1, 1]} : vector<8x128xf32> to vector<1x32xf32>
    %149 = vector.extract_strided_slice %135 {offsets = [4, 0], sizes = [1, 32], strides = [1, 1]} : vector<8x128xf32> to vector<1x32xf32>
    %150 = vector.extract_strided_slice %135 {offsets = [5, 0], sizes = [1, 32], strides = [1, 1]} : vector<8x128xf32> to vector<1x32xf32>
    %151 = vector.extract_strided_slice %135 {offsets = [6, 0], sizes = [1, 128], strides = [1, 1]} : vector<8x128xf32> to vector<1x128xf32>
    %152 = vector.extract_strided_slice %135 {offsets = [7, 0], sizes = [1, 32], strides = [1, 1]} : vector<8x128xf32> to vector<1x32xf32>
    %cst_45 = arith.constant dense<0.000000e+00> : vector<8xf32>
    %153 = vector.multi_reduction <add>, %132, %cst_45 [1] : vector<8x32xf32> to vector<8xf32>
    %154 = vector.shape_cast %153 : vector<8xf32> to vector<8x1xf32>
    %cst_46 = arith.constant 3.200000e+01 : f32
    %155 = vector.broadcast %cst_46 : f32 to vector<8x1xf32>
    %156 = arith.divf %154, %155 : vector<8x1xf32>
    %157 = vector.broadcast %156 : vector<8x1xf32> to vector<8x32xf32>
    %158 = arith.subf %132, %157 : vector<8x32xf32>
    %159 = arith.mulf %158, %158 : vector<8x32xf32>
    %cst_47 = arith.constant dense<0.000000e+00> : vector<8xf32>
    %160 = vector.multi_reduction <add>, %159, %cst_47 [1] : vector<8x32xf32> to vector<8xf32>
    %161 = vector.shape_cast %160 : vector<8xf32> to vector<8x1xf32>
    %cst_48 = arith.constant 3.200000e+01 : f32
    %162 = vector.broadcast %cst_48 : f32 to vector<8x1xf32>
    %163 = arith.divf %161, %162 : vector<8x1xf32>
    %164 = vector.broadcast %156 : vector<8x1xf32> to vector<8x32xf32>
    %165 = arith.subf %132, %164 : vector<8x32xf32>
    %cst_49 = arith.constant 9.99999997E-7 : f32
    %166 = vector.broadcast %cst_49 : f32 to vector<8x1xf32>
    %167 = arith.addf %163, %166 : vector<8x1xf32>
    %168 = math.rsqrt %167 : vector<8x1xf32>
    %169 = vector.broadcast %168 : vector<8x1xf32> to vector<8x32xf32>
    %170 = arith.mulf %165, %169 : vector<8x32xf32>
    %171 = vector.broadcast %145 : vector<1x32xf32> to vector<8x32xf32>
    %172 = arith.mulf %170, %171 : vector<8x32xf32>
    %173 = vector.broadcast %146 : vector<1x32xf32> to vector<8x32xf32>
    %174 = arith.addf %172, %173 : vector<8x32xf32>
    %175 = arith.truncf %174 : vector<8x32xf32> to vector<8x32xbf16>
    %176 = vector.extract_strided_slice %138 {offsets = [0, 0], sizes = [32, 96], strides = [1, 1]} : vector<32x128xbf16> to vector<32x96xbf16>
    %cst_50 = arith.constant dense<0.000000e+00> : vector<8x96xf32>
    %177 = tpu.matmul %175, %176, %cst_50 {dimension_numbers = #tpu.dot_dimension_numbers<[1], [0], [0], [1], [0, 0, 1, 1], [], []>} : vector<8x32xbf16>, vector<32x96xbf16>, vector<8x96xf32> -> vector<8x96xf32>
    %178 = vector.broadcast %147 : vector<1x96xf32> to vector<8x96xf32>
    %179 = arith.addf %177, %178 : vector<8x96xf32>
    %180 = vector.extract_strided_slice %179 {offsets = [0, 0], sizes = [8, 32], strides = [1, 1]} : vector<8x96xf32> to vector<8x32xf32>
    %cst_51 = arith.constant 2.500000e-01 : f32
    %181 = vector.broadcast %cst_51 : f32 to vector<8x32xf32>
    %182 = arith.mulf %180, %181 : vector<8x32xf32>
    %183 = vector.extract_strided_slice %179 {offsets = [0, 32], sizes = [8, 32], strides = [1, 1]} : vector<8x96xf32> to vector<8x32xf32>
    %184 = vector.extract_strided_slice %179 {offsets = [0, 64], sizes = [8, 32], strides = [1, 1]} : vector<8x96xf32> to vector<8x32xf32>
    %185 = vector.shape_cast %182 : vector<8x32xf32> to vector<8x2x16xf32>
    %186 = tpu.transpose %185, [1, 0, 2] : vector<8x2x16xf32> -> vector<2x8x16xf32>
    %187 = vector.shape_cast %183 : vector<8x32xf32> to vector<8x2x16xf32>
    %188 = tpu.transpose %187, [1, 0, 2] : vector<8x2x16xf32> -> vector<2x8x16xf32>
    %189 = vector.shape_cast %184 : vector<8x32xf32> to vector<8x2x16xf32>
    %190 = tpu.transpose %189, [1, 0, 2] : vector<8x2x16xf32> -> vector<2x8x16xf32>
    %191 = arith.truncf %186 : vector<2x8x16xf32> to vector<2x8x16xbf16>
    %192 = arith.truncf %188 : vector<2x8x16xf32> to vector<2x8x16xbf16>
    "tpu.trace_start"() <{level = 10 : i32, message = "hqd,hkd->hqk"}> : () -> ()
    %cst_52 = arith.constant dense<0.000000e+00> : vector<2x8x8xf32>
    %193 = tpu.matmul %191, %192, %cst_52 {dimension_numbers = #tpu.dot_dimension_numbers<[2], [2], [1], [1], [0, 0, 0, 1, 1, 1], [0], [0]>} : vector<2x8x16xbf16>, vector<2x8x16xbf16>, vector<2x8x8xf32> -> vector<2x8x8xf32>
    %cst_53 = arith.constant -1.000000e+30 : f32
    "tpu.trace_stop"() : () -> ()
    %194 = vector.broadcast %cst_53 : f32 to vector<2x8x8xf32>
    %195 = arith.select %9, %193, %194 : vector<2x8x8xi1>, vector<2x8x8xf32>
    %cst_54 = arith.constant dense<0xFF800000> : vector<2x8xf32>
    %196 = vector.multi_reduction <maximumf>, %195, %cst_54 [2] : vector<2x8x8xf32> to vector<2x8xf32>
    %197 = vector.shape_cast %196 : vector<2x8xf32> to vector<2x8x1xf32>
    %198 = vector.broadcast %197 : vector<2x8x1xf32> to vector<2x8x8xf32>
    %199 = arith.subf %195, %198 : vector<2x8x8xf32>
    %200 = math.exp %199 : vector<2x8x8xf32>
    %cst_55 = arith.constant dense<0.000000e+00> : vector<2x8xf32>
    %201 = vector.multi_reduction <add>, %200, %cst_55 [2] : vector<2x8x8xf32> to vector<2x8xf32>
    %202 = vector.shape_cast %201 : vector<2x8xf32> to vector<2x8x1xf32>
    %203 = tpu.reciprocal %202 {approx = true} : vector<2x8x1xf32> -> vector<2x8x1xf32>
    %204 = vector.broadcast %203 : vector<2x8x1xf32> to vector<2x8x8xf32>
    %205 = arith.mulf %200, %204 : vector<2x8x8xf32>
    %206 = arith.truncf %205 : vector<2x8x8xf32> to vector<2x8x8xbf16>
    %207 = arith.truncf %190 : vector<2x8x16xf32> to vector<2x8x16xbf16>
    "tpu.trace_start"() <{level = 10 : i32, message = "hqk,hkd->hqd"}> : () -> ()
    %cst_56 = arith.constant dense<0.000000e+00> : vector<2x8x16xf32>
    %208 = tpu.matmul %206, %207, %cst_56 {dimension_numbers = #tpu.dot_dimension_numbers<[2], [1], [1], [2], [0, 0, 0, 1, 1, 2], [0], [0]>} : vector<2x8x8xbf16>, vector<2x8x16xbf16>, vector<2x8x16xf32> -> vector<2x8x16xf32>
    "tpu.trace_stop"() : () -> ()
    %209 = tpu.transpose %208, [1, 0, 2] : vector<2x8x16xf32> -> vector<8x2x16xf32>
    %210 = vector.shape_cast %209 : vector<8x2x16xf32> to vector<8x32xf32>
    %211 = arith.truncf %210 : vector<8x32xf32> to vector<8x32xbf16>
    %212 = vector.extract_strided_slice %138 {offsets = [0, 96], sizes = [32, 32], strides = [1, 1]} : vector<32x128xbf16> to vector<32x32xbf16>
    %cst_57 = arith.constant dense<0.000000e+00> : vector<8x32xf32>
    %213 = tpu.matmul %211, %212, %cst_57 {dimension_numbers = #tpu.dot_dimension_numbers<[1], [0], [0], [1], [0, 0, 1, 1], [], []>} : vector<8x32xbf16>, vector<32x32xbf16>, vector<8x32xf32> -> vector<8x32xf32>
    %214 = arith.addf %132, %213 : vector<8x32xf32>
    %215 = vector.broadcast %148 : vector<1x32xf32> to vector<8x32xf32>
    %216 = arith.addf %214, %215 : vector<8x32xf32>
    %cst_58 = arith.constant dense<0.000000e+00> : vector<8xf32>
    %217 = vector.multi_reduction <add>, %216, %cst_58 [1] : vector<8x32xf32> to vector<8xf32>
    %218 = vector.shape_cast %217 : vector<8xf32> to vector<8x1xf32>
    %cst_59 = arith.constant 3.200000e+01 : f32
    %219 = vector.broadcast %cst_59 : f32 to vector<8x1xf32>
    %220 = arith.divf %218, %219 : vector<8x1xf32>
    %221 = vector.broadcast %220 : vector<8x1xf32> to vector<8x32xf32>
    %222 = arith.subf %216, %221 : vector<8x32xf32>
    %223 = arith.mulf %222, %222 : vector<8x32xf32>
    %cst_60 = arith.constant dense<0.000000e+00> : vector<8xf32>
    %224 = vector.multi_reduction <add>, %223, %cst_60 [1] : vector<8x32xf32> to vector<8xf32>
    %225 = vector.shape_cast %224 : vector<8xf32> to vector<8x1xf32>
    %cst_61 = arith.constant 3.200000e+01 : f32
    %226 = vector.broadcast %cst_61 : f32 to vector<8x1xf32>
    %227 = arith.divf %225, %226 : vector<8x1xf32>
    %228 = vector.broadcast %220 : vector<8x1xf32> to vector<8x32xf32>
    %229 = arith.subf %216, %228 : vector<8x32xf32>
    %cst_62 = arith.constant 9.99999997E-7 : f32
    %230 = vector.broadcast %cst_62 : f32 to vector<8x1xf32>
    %231 = arith.addf %227, %230 : vector<8x1xf32>
    %232 = math.rsqrt %231 : vector<8x1xf32>
    %233 = vector.broadcast %232 : vector<8x1xf32> to vector<8x32xf32>
    %234 = arith.mulf %229, %233 : vector<8x32xf32>
    %235 = vector.broadcast %149 : vector<1x32xf32> to vector<8x32xf32>
    %236 = arith.mulf %234, %235 : vector<8x32xf32>
    %237 = vector.broadcast %150 : vector<1x32xf32> to vector<8x32xf32>
    %238 = arith.addf %236, %237 : vector<8x32xf32>
    %239 = arith.truncf %238 : vector<8x32xf32> to vector<8x32xbf16>
    %cst_63 = arith.constant dense<0.000000e+00> : vector<8x128xf32>
    %240 = tpu.matmul %239, %141, %cst_63 {dimension_numbers = #tpu.dot_dimension_numbers<[1], [0], [0], [1], [0, 0, 1, 1], [], []>} : vector<8x32xbf16>, vector<32x128xbf16>, vector<8x128xf32> -> vector<8x128xf32>
    %241 = vector.broadcast %151 : vector<1x128xf32> to vector<8x128xf32>
    %242 = arith.addf %240, %241 : vector<8x128xf32>
    %cst_64 = arith.constant 5.000000e-01 : f32
    %243 = vector.broadcast %cst_64 : f32 to vector<8x128xf32>
    %244 = arith.mulf %243, %242 : vector<8x128xf32>
    %cst_65 = arith.constant 0.707106769 : f32
    %245 = vector.broadcast %cst_65 : f32 to vector<8x128xf32>
    %246 = arith.mulf %242, %245 : vector<8x128xf32>
    %247 = math.erf %246 : vector<8x128xf32>
    %cst_66 = arith.constant 1.000000e+00 : f32
    %248 = vector.broadcast %cst_66 : f32 to vector<8x128xf32>
    %249 = arith.addf %248, %247 : vector<8x128xf32>
    %250 = arith.mulf %244, %249 : vector<8x128xf32>
    %251 = arith.truncf %250 : vector<8x128xf32> to vector<8x128xbf16>
    %cst_67 = arith.constant dense<0.000000e+00> : vector<8x32xf32>
    %252 = tpu.matmul %251, %144, %cst_67 {dimension_numbers = #tpu.dot_dimension_numbers<[1], [0], [0], [1], [0, 0, 1, 1], [], []>} : vector<8x128xbf16>, vector<128x32xbf16>, vector<8x32xf32> -> vector<8x32xf32>
    %253 = arith.addf %216, %252 : vector<8x32xf32>
    %254 = vector.broadcast %152 : vector<1x32xf32> to vector<8x32xf32>
    %255 = arith.addf %253, %254 : vector<8x32xf32>
    %c2_i32 = arith.constant 2 : i32
    %c0_68 = arith.constant 0 : index
    %c0_69 = arith.constant 0 : index
    %c0_70 = arith.constant 0 : index
    %256 = vector.load %arg8[%c0_68, %c0_69, %c0_70] : memref<1x8x32xf32, #tpu.memory_space<vmem>>, vector<1x8x32xf32>
    %257 = vector.shape_cast %256 : vector<1x8x32xf32> to vector<8x32xf32>
    %258 = vector.shape_cast %255 : vector<8x32xf32> to vector<1x8x32xf32>
    tpu.vector_store %arg8[%c0_68, %c0_69, %c0_70], %258 {strides = array<i32>} : memref<1x8x32xf32, #tpu.memory_space<vmem>>, vector<1x8x32xf32>,
    return
  }
  func.func @transform_0(%arg0: i32) -> (i32, i32, i32) {
    %c0_i32 = arith.constant 0 : i32
    %c0_i32_0 = arith.constant 0 : i32
    %c0_i32_1 = arith.constant 0 : i32
    return %arg0, %c0_i32, %c0_i32_0 : i32, i32, i32
  }
  func.func @transform_1(%arg0: i32) -> (i32, i32) {
    %c0_i32 = arith.constant 0 : i32
    %c0_i32_0 = arith.constant 0 : i32
    %c0_i32_1 = arith.constant 0 : i32
    return %c0_i32, %c0_i32_0 : i32, i32
  }
  func.func @transform_2(%arg0: i32) -> (i32, i32) {
    %c0_i32 = arith.constant 0 : i32
    %c0_i32_0 = arith.constant 0 : i32
    %c0_i32_1 = arith.constant 0 : i32
    return %c0_i32, %c0_i32_0 : i32, i32
  }
  func.func @transform_3(%arg0: i32) -> (i32, i32, i32) {
    %c0_i32 = arith.constant 0 : i32
    %c0_i32_0 = arith.constant 0 : i32
    %c0_i32_1 = arith.constant 0 : i32
    %c0_i32_2 = arith.constant 0 : i32
    return %c0_i32, %c0_i32_0, %c0_i32_1 : i32, i32, i32
  }
  func.func @transform_4(%arg0: i32) -> (i32, i32, i32) {
    %c0_i32 = arith.constant 0 : i32
    %c0_i32_0 = arith.constant 0 : i32
    %c0_i32_1 = arith.constant 0 : i32
    %c0_i32_2 = arith.constant 0 : i32
    return %c0_i32, %c0_i32_0, %c0_i32_1 : i32, i32, i32
  }
  func.func @transform_5(%arg0: i32) -> (i32, i32, i32) {
    %c0_i32 = arith.constant 0 : i32
    %c0_i32_0 = arith.constant 0 : i32
    %c0_i32_1 = arith.constant 0 : i32
    %c0_i32_2 = arith.constant 0 : i32
    return %c0_i32, %c0_i32_0, %c0_i32_1 : i32, i32, i32
  }
  func.func @transform_6(%arg0: i32) -> (i32, i32, i32) {
    %c0_i32 = arith.constant 0 : i32
    %c0_i32_0 = arith.constant 0 : i32
    %c0_i32_1 = arith.constant 0 : i32
    %c0_i32_2 = arith.constant 0 : i32
    return %c0_i32, %c0_i32_0, %c0_i32_1 : i32, i32, i32
  }
  func.func @transform_7(%arg0: i32) -> (i32, i32, i32) {
    %c0_i32 = arith.constant 0 : i32
    %c0_i32_0 = arith.constant 0 : i32
    %c0_i32_1 = arith.constant 0 : i32
    return %arg0, %c0_i32, %c0_i32_0 : i32, i32, i32
  }
}

</mosaic_0001>

<bundles_post_ra>
// kernel: timm_vit_backbone_forward.1
= control target key start
LH: loop header
LB: loop body
LE: loop exit
PB: predicated region body
PF: predicated region fallthrough
CT: control target
= control target key end

     0   :  { %s3024_s24 = smov 0   ;;  %s3558_s0 = inlined_call_operand.vmem [shape: f32[2,8,192], index: 0, kind: input, shape index: {}]   ;;  %s3559_s1 = inlined_call_operand.vmem [shape: bf16[192,32], index: 1, kind: input, shape index: {}]   ;;  %s3560_s2 = inlined_call_operand.vmem [shape: f32[8,32], index: 2, kind: input, shape index: {}]   ;;  %s3561_s3 = inlined_call_operand.vmem [shape: f32[2,8,128], index: 3, kind: input, shape index: {}]   ;;  %s3562_s4 = inlined_call_operand.vmem [shape: bf16[2,32,128], index: 4, kind: input, shape index: {}]   ;;  %s3563_s5 = inlined_call_operand.vmem [shape: bf16[2,32,128], index: 5, kind: input, shape index: {}]   ;;  %s3564_s6 = inlined_call_operand.vmem [shape: bf16[2,128,32], index: 6, kind: input, shape index: {}]   ;;  %s3565_s7 = inlined_call_operand.vmem [shape: f32[2,8,32], index: 7, kind: output, shape index: {}]  }
   0x1 LB: > { %s2593_s25 = sadd.s32 4294967295, %s2972_s24   ;;  %p2597_p0 = scmp.ge.s32.totalorder %s2972_s24, 1  ;;  %s2972_s24 = sphi %s3024_s24, %s17_s24  }
   0x2   : > { %p237_p1 = scmp.lt.s32.totalorder %s2972_s24, 3 }
   0x4   : > { %p238_p2 = pnand %p2597_p0, %p237_p1 }
   0x5   : > { %v2902_v0 = vld [vmem:[%s3559_s1] sm:$0xff] (!%p238_p2)   ;;  %v2974_v1 = vmov (!%p238_p2), 0   ;;  %p268_p3 = scmp.lt.s32.totalorder (!%p238_p2), %s2593_s25, 1  ;;  %v2903_v2 = vld [vmem:[%s3559_s1 + $0x8] sm:$0xff] (!%p238_p2)   ;;  %v2904_v3 = vld [vmem:[%s3559_s1 + $0x10] sm:$0xff] (!%p238_p2)   ;;  %vm379_vm0 = vcmask (!%p238_p2), 523264   ;;  %v423_v34 = vlaneseq (!%p238_p2) }
   0x6   : > { %241 = sbr.rel (%p238_p2) target bundleno = 5635 (0x1603), region = 48  ;;  %383 = vmatprep.subr.bf16.mxu0 (!%p238_p2), %v2974_v1  ;;  %v2905_v4 = vld [vmem:[%s3559_s1 + $0x18] sm:$0xff] (!%p238_p2)   ;;  %v2906_v5 = vld [vmem:[%s3559_s1 + $0x20] sm:$0xff] (!%p238_p2)   ;;  %v2907_v8 = vld [vmem:[%s3559_s1 + $0x28] sm:$0xff] (!%p238_p2)   ;;  %vm451_vm1 = vcmask (!%p238_p2), 261120   ;;  %v2975_v30 = vmov (!%p238_p2), 0.0  }
   0x7   : > { %384 = vmatpush1.bf16.msra.mxu0 (!%p238_p2), %v2902_v0  ;;  %v2908_v9 = vld [vmem:[%s3559_s1 + $0x30] sm:$0xff] (!%p238_p2)   ;;  %v2909_v10 = vld [vmem:[%s3559_s1 + $0x38] sm:$0xff] (!%p238_p2)   ;;  %v2910_v11 = vld [vmem:[%s3559_s1 + $0x40] sm:$0xff] (!%p238_p2)   ;;  %2748 = vmatprep.subr.bf16.mxu1 (!%p238_p2), %v2975_v30  ;;  %vm2976_vm2 = vmmov (!%p238_p2), 0   ;;  %v3108_v36 = vshrl.u32 (!%p238_p2), %v423_v34, 7  ;;  %s2977_s18 = smov (!%p238_p2), 112  }
   0x8   : > { %385 = vmatprep.subr.bf16.mxu0 (!%p238_p2), %v2974_v1  ;;  %v2911_v12 = vld [vmem:[%s3559_s1 + $0x48] sm:$0xff] (!%p238_p2)   ;;  %v2912_v13 = vld [vmem:[%s3559_s1 + $0x50] sm:$0xff] (!%p238_p2)   ;;  %v2913_v14 = vld [vmem:[%s3559_s1 + $0x58] sm:$0xff] (!%p238_p2)   ;;  %2752 = vmatprep.mubr.msk.bf16.mxu1 (!%p238_p2), %vm2976_vm2, %v2975_v30  ;;  %s2978_s19 = smov (!%p238_p2), 96   ;;  %v2979_v57 = vmov (!%p238_p2), 1983009808  }
   0x9   : > { %v306_v17 = vld [vmem:[%s3560_s2] sm:$0xff] (!%p238_p2)  ;;  %v3099_v31 = vld [vmem:[%s3562_s4 + $0x8] sm:$0xff] (!%p238_p2)   ;;  %v468_v37 = vsub.s32 (!%p238_p2), 0, %v3108_v36  ;;  %v473_v39 = vsub.s32 (!%p238_p2), 1, %v3108_v36  ;;  %v479_v47 = vsub.s32 (!%p238_p2), 2, %v3108_v36  ;;  %v543_v58 = vunpack.c.l.s4 (!%p238_p2), %v2979_v57  ;;  %s2981_s20 = smov (!%p238_p2), 64  }
   0xa   : > { %v3090_v29 = vld [vmem:[%s3562_s4] sm:$0xff] (!%p238_p2)   ;;  %v2980_v63 = vmov (!%p238_p2), 1934713408   ;;  %vm908_vm3 = vcmask (!%p238_p2), 130048   ;;  %vm1003_vm5 = vcmask (!%p238_p2), 64512   ;;  %vm1033_vm6 = vcmask (!%p238_p2), 1043456  }
   0xb   : > { %386 = vmatpush1.bf16.msra.mxu0 (!%p238_p2), %v2903_v2  ;;  %2749 = vmatpush3.bf16.msra.mxu1 (!%p238_p2), %v3090_v29  ;;  %v3114_v38 = vld [vmem:[%s3561_s3] sm:$0xff] (!%p238_p2)  ;;  %v544_v60 = vunpack.c.0.s8 (!%p238_p2), %v543_v58  ;;  %v574_v0 = vunpack.c.l.s4 (!%p238_p2), %v2980_v63  ;;  %s2982_s21 = smov (!%p238_p2), 32   ;;  %s2983_s22 = smov (!%p238_p2), 16  }
   0xc   : > { %387 = vmatprep.subr.bf16.mxu0 (!%p238_p2), %v2974_v1  ;;  %2750 = vmatprep.subr.bf16.mxu1 (!%p238_p2), %v2975_v30  ;;  %v469_v40 = vrot.slane (!%p238_p2), %v3114_v38, %v468_v37  ;;  %v474_v43 = vrot.slane (!%p238_p2), %v3114_v38, %v473_v39  ;;  %v480_v48 = vrot.slane (!%p238_p2), %v3114_v38, %v479_v47 }
   0xd   : > { %s3567_s25 = smov (!%p268_p3, %s2593_s25), 1  ;;  %v3144_v62 = vsub.s32 %v544_v60, %v3108_v36 }
   0xe   : > { %s2695_s9 = sshll.u32 %s3567_s25, 4  ;;  %s2600_s11 = sshll.u32 %s3567_s25, 3 }
   0xf   : > { %s3047_s12 = scalar_lea.vmem %s3558_s0, %s2695_s9  ;;  %388 = vmatpush1.bf16.msra.mxu0 %v2904_v3  ;;  %2751 = vmatpush3.bf16.msra.mxu1 %v3099_v31  ;;  %v575_v3 = vunpack.c.0.s8 %v574_v0 }
  0x10   : > { %389 = vmatprep.subr.bf16.mxu0 %v2974_v1  ;;  %v279_v6 = vld [vmem:[%s3047_s12 + $0x8] sm:$0xff]  ;;  %v278_v15 = vld [vmem:[%s3047_s12] sm:$0xff]  ;;  %2756 = vmatprep.subr.bf16.mxu1 %v2975_v30 }
  0x11   : > { %v281_v7 = vpack.c.bf16 %v279_v6, %v279_v6  ;;  %v280_v16 = vpack.c.bf16 %v278_v15, %v278_v15 }
  0x13   : > { %390 = vmatpush1.bf16.msra.mxu0 %v2905_v4  ;;  %2613 = vmatprep.mubr.msk.bf16.mxu0 %vm379_vm0, %v281_v7 }
  0x14   : > { %391 = vmatprep.subr.bf16.mxu0 %v2974_v1 }
  0x17   : > { %392 = vmatpush1.bf16.msra.mxu0 %v2906_v5 }
  0x18   : > { %393 = vmatprep.subr.bf16.mxu0 %v2974_v1 }
  0x1b   : > { %394 = vmatpush1.bf16.msra.mxu0 %v2907_v8 }
  0x1c   : > { %395 = vmatprep.subr.bf16.mxu0 %v2974_v1 }
  0x1f   : > { %396 = vmatpush1.bf16.msra.mxu0 %v2908_v9 }
  0x20   : > { %397 = vmatprep.subr.bf16.mxu0 %v2974_v1 }
  0x23   : > { %398 = vmatpush1.bf16.msra.mxu0 %v2909_v10  ;;  %v3153_v10 = vsub.s32 %v575_v3, %v3108_v36 }
  0x24   : > { %399 = vmatprep.subr.bf16.mxu0 %v2974_v1 }
  0x27   : > { %400 = vmatpush1.bf16.msra.mxu0 %v2910_v11 }
  0x28   : > { %401 = vmatprep.subr.bf16.mxu0 %v2974_v1 }
  0x2b   : > { %402 = vmatpush1.bf16.msra.mxu0 %v2911_v12 }
  0x2c   : > { %403 = vmatprep.subr.bf16.mxu0 %v2974_v1 }
  0x2f   : > { %404 = vmatpush1.bf16.msra.mxu0 %v2912_v13 }
  0x30   : > { %405 = vmatprep.subr.bf16.mxu0 %v2974_v1 }
  0x33   : > { %406 = vmatpush1.bf16.msra.mxu0 %v2913_v14 }
  0x34   : > { %2824 = vmatprep.subr.bf16.mxu0 %v2975_v30 }
  0x36   : > { %416 = vmatmul.mubr.bf16.vlgmr.msra.gmra.mrb[0].mxu0 %v280_v16 }
  0x37   : > { %2826 = vmatprep.mubr.msk.bf16.mxu0 %vm2976_vm2, %v2975_v30 }
 0x109   : > { %v417_v18 = vpop.f32.mrb[0].mxu0 }
 0x10a   : > { %v3081_v19 = vadd.f32 %v417_v18, %v306_v17  ;;  %v419_v20 = vpop.f32.mrb[1].mxu0 }
 0x10b   : > { %v420_v21 = vpop.f32.mrb[2].mxu0 }
 0x10c   : > { %v421_v22 = vpop.f32.mrb[3].mxu0  ;;  %v452_v23 = vsel %vm451_vm1, %v3081_v19, 0.0 }
 0x10d   : > { %453 = vadd.xlane.f32.xlu0 %v452_v23 }
 0x19a   : > { %v454_v24 = vpop.xlane.xlu0 %453 }
 0x19b   : > { %v456_v25 = vmul.f32 0.03125, %v454_v24 }
 0x19d   : > { %v457_v26 = vsub.f32 %v3081_v19, %v456_v25 }
 0x19f   : > { %v458_v27 = vmul.f32 %v457_v26, %v457_v26 }
 0x1a1   : > { %v459_v28 = vsel %vm451_vm1, %v458_v27, 0.0 }
 0x1a2   : > { %460 = vadd.xlane.f32.xlu0 %v459_v28 }
 0x22f   : > { %v461_v32 = vpop.xlane.xlu0 %460 }
 0x230   : > { %v462_v33 = vmul.f32 0.03125, %v461_v32 }
 0x232   : > { %v463_v35 = vadd.f32 1e-06, %v462_v33 }
 0x234   : > { %2938 = vrsqrt.f32 %v463_v35 }
 0x23e   : > { %v2939_v41 = vpop.eup %2938 }
 0x23f   : > { %v465_v42 = vmul.f32 %v2939_v41, %v457_v26 }
 0x241   : > { %v470_v44 = vmul.f32 %v469_v40, %v465_v42 }
 0x243   : > { %v475_v45 = vadd.f32 %v474_v43, %v470_v44 }
 0x245   : > { %v476_v46 = vpack.c.bf16 %v475_v45, %v475_v45 }
 0x247   : > { %2753 = vmatmul.mubr.msk.bf16.vlgmr.msra.gmra.mrb[0].mxu1 %vm451_vm1, %v476_v46 }
 0x248   : > { %2758 = vmatprep.mubr.msk.bf16.mxu1 %vm2976_vm2, %v2975_v30 }
 0x31a   : > { %v530_v49 = vpop.f32.mrb[0].mxu1 }
 0x31b   : > { %v3130_v50 = vadd.f32 %v530_v49, %v480_v48  ;;  %v2754_v51 = vpop.f32.mrb[1].mxu1 }
 0x31c   : > { %v533_v52 = vpop.f32.mrb[2].mxu1 }
 0x31d   : > { %658 = vrot.lane.b32.xlu1 %v3130_v50, %s2977_s18  ;;  %v2755_v53 = vpop.f32.mrb[3].mxu1  ;;  %v536_v54 = vmul.f32 0.25, %v3130_v50 }
 0x31f   : > { %v541_v1 = vcombine.high %v536_v54, %v2975_v30  ;;  %v548_v6 = vrot.slane %v536_v54, %v3144_v62 }
 0x321   : > { %660 = vrot.lane.b32.xlu1 %v3130_v50, %s2978_s19  ;;  %v555_v4 = vrot.slane %v541_v1, %v3144_v62 }
 0x325   : > { %538 = vrot.lane.b32.xlu1 %v536_v54, %s2977_s18 }
 0x38f   : > { %v3138_v55 = vpop.permute.xlu1 %658 }
 0x390   : > { %662 = vrot.lane.b32.xlu0 %v3138_v55, %s2978_s19 }
 0x393   : > { %v661_v56 = vpop.permute.xlu1 %660 }
 0x394   : > { %v666_v9 = vcombine.high %v661_v56, %v2975_v30  ;;  %v673_v14 = vrot.slane %v661_v56, %v3144_v62 }
 0x396   : > { %v680_v20 = vrot.slane %v666_v9, %v3144_v62 }
 0x397   : > { %v539_v59 = vpop.permute.xlu1 %538 }
 0x398   : > { %v556_v61 = vcombine.high %v539_v59, %v2975_v30  ;;  %v563_v5 = vrot.slane %v539_v59, %v3144_v62 }
 0x39a   : > { %v570_v2 = vrot.slane %v556_v61, %v3144_v62  ;;  %v571_v11 = vcombine.low %v548_v6, %v563_v5  ;;  %v572_v12 = vcombine.high %v548_v6, %v563_v5 }
 0x39c   : > { %v587_v7 = vcombine.low %v555_v4, %v570_v2  ;;  %v588_v8 = vcombine.high %v555_v4, %v570_v2  ;;  %v579_v24 = vrot.slane %v571_v11, %v3153_v10  ;;  %v586_v25 = vrot.slane %v572_v12, %v3153_v10 }
 0x39e   : > { %v595_v17 = vrot.slane %v587_v7, %v3153_v10  ;;  %v602_v18 = vrot.slane %v588_v8, %v3153_v10  ;;  %v607_v44 = vcombine.low %v579_v24, %v586_v25  ;;  %v2617_v45 = vcombine.high %v579_v24, %v586_v25 }
 0x3a0   : > { %v623_v33 = vcombine.low %v595_v17, %v602_v18  ;;  %v2618_v35 = vcombine.high %v595_v17, %v602_v18  ;;  %v614_v58 = vrot.slane %v607_v44, %v3144_v62  ;;  %v622_v59 = vrot.slane %v2617_v45, %v3144_v62 }
 0x3a2   : > { %v630_v52 = vrot.slane %v623_v33, %v3144_v62  ;;  %v638_v53 = vrot.slane %v2618_v35, %v3144_v62  ;;  %v639_v1 = vcombine.low %v614_v58, %v622_v59 }
 0x3a4   : > { %v647_v61 = vcombine.low %v630_v52, %v638_v53  ;;  %v646_v5 = vrot.slane %v639_v1, %v3153_v10 }
 0x3a6   : > { %v654_v4 = vrot.slane %v647_v61, %v3153_v10 }
 0x3a8   : > { %v655_v8 = vcombine.low %v646_v5, %v654_v4 }
 0x3aa   : > { %v904_v11 = vpack.c.bf16 %v655_v8, %v655_v8 }
 0x402   : > { %v663_v13 = vpop.permute.xlu0 %662 }
 0x403   : > { %v681_v15 = vcombine.high %v663_v13, %v2975_v30  ;;  %v688_v16 = vrot.slane %v663_v13, %v3144_v62  ;;  %v656_v13 = vcombine.high %v646_v5, %v654_v4 }
 0x405   : > { %v695_v21 = vrot.slane %v681_v15, %v3144_v62  ;;  %v696_v22 = vcombine.low %v673_v14, %v688_v16  ;;  %v697_v23 = vcombine.high %v673_v14, %v688_v16  ;;  %v905_v14 = vpack.c.bf16 %v656_v13, %v656_v13 }
 0x406   : > { %v3191_v15 = vand.u32 127, %v423_v34 }
 0x407   : > { %v704_v26 = vrot.slane %v696_v22, %v3153_v10  ;;  %v711_v27 = vrot.slane %v697_v23, %v3153_v10  ;;  %v712_v28 = vcombine.low %v680_v20, %v695_v21  ;;  %v713_v32 = vcombine.high %v680_v20, %v695_v21 }
 0x408   : > { %vm425_vm4 = vcmp.lt.s32.totalorder %v3191_v15, 5 }
 0x409   : > { %v720_v40 = vrot.slane %v712_v28, %v3153_v10  ;;  %v727_v41 = vrot.slane %v713_v32, %v3153_v10  ;;  %v732_v42 = vcombine.low %v704_v26, %v711_v27  ;;  %v2619_v43 = vcombine.high %v704_v26, %v711_v27 }
 0x40b   : > { %v739_v46 = vrot.slane %v732_v42, %v3144_v62  ;;  %v747_v48 = vrot.slane %v2619_v43, %v3144_v62  ;;  %v748_v49 = vcombine.low %v720_v40, %v727_v41  ;;  %v2620_v51 = vcombine.high %v720_v40, %v727_v41 }
 0x40d   : > { %v755_v54 = vrot.slane %v748_v49, %v3144_v62  ;;  %v763_v56 = vrot.slane %v2620_v51, %v3144_v62  ;;  %v764_v57 = vcombine.low %v739_v46, %v747_v48 }
 0x40f   : > { %v772_v60 = vcombine.low %v755_v54, %v763_v56  ;;  %v771_v63 = vrot.slane %v764_v57, %v3153_v10 }
 0x411   : > { %v779_v0 = vrot.slane %v772_v60, %v3153_v10 }
 0x413   : > { %v780_v2 = vcombine.low %v771_v63, %v779_v0  ;;  %v781_v7 = vcombine.high %v771_v63, %v779_v0 }
 0x415   : > { %v906_v3 = vpack.c.bf16 %v780_v2, %v780_v2  ;;  %v907_v9 = vpack.c.bf16 %v781_v7, %v781_v7 }
 0x417   : > { %v913_v6 = vsel %vm908_vm3, %v906_v3, 0  ;;  %v959_v12 = vsel %vm908_vm3, %v907_v9, 0 }
 0x418   : > { %2757 = vmatpush3.bf16.xpose.msra.mxu1 %v913_v6 }
 0x419   : > { %2762 = vmatprep.subr.bf16.mxu1 %v2975_v30 }
 0x41f   : > { %2759 = vmatmul.mubr.msk.bf16.vlgmr.msra.gmra.mrb[4].mxu1 %vm908_vm3, %v904_v11 }
 0x420   : > { %2763 = vmatpush3.bf16.xpose.msra.mxu1 %v959_v12  ;;  %2764 = vmatprep.mubr.msk.bf16.mxu1 %vm2976_vm2, %v2975_v30 }
 0x421   : > { %2768 = vmatprep.subr.bf16.mxu1 %v2975_v30 }
 0x427   : > { %2765 = vmatmul.mubr.msk.bf16.vlgmr.msra.gmra.mrb[8].mxu1 %vm908_vm3, %v905_v14 }
 0x428   : > { %2770 = vmatprep.mubr.msk.bf16.mxu1 %vm2976_vm2, %v2975_v30 }
 0x4f2   : > { %v949_v16 = vpop.f32.mrb[4].mxu1 }
 0x4f3   : > { %v1001_v17 = vsel %vm425_vm4, %v949_v16, -1e+30  ;;  %v2760_v18 = vpop.f32.mrb[5].mxu1 }
 0x4f4   : > { %v952_v20 = vpop.f32.mrb[6].mxu1  ;;  %v1004_v21 = vsel %vm1003_vm5, %v1001_v17, -inf }
 0x4f5   : > { %1005 = vmax.xlane.f32.xlu1 %v1004_v21  ;;  %v2761_v22 = vpop.f32.mrb[7].mxu1 }
 0x4fa   : > { %v995_v23 = vpop.f32.mrb[8].mxu1 }
 0x4fb   : > { %v1002_v24 = vsel %vm425_vm4, %v995_v23, -1e+30  ;;  %v2766_v25 = vpop.f32.mrb[9].mxu1 }
 0x4fc   : > { %v998_v34 = vpop.f32.mrb[10].mxu1  ;;  %v1007_v26 = vsel %vm1003_vm5, %v1002_v24, -inf }
 0x4fd   : > { %1008 = vmax.xlane.f32.xlu0 %v1007_v26  ;;  %v2767_v27 = vpop.f32.mrb[11].mxu1 }
 0x513   : > { %784 = vrot.lane.b32.xlu0 %v3138_v55, %s2981_s20 }
 0x517   : > { %1245 = vrot.lane.b32.xlu0 %v3090_v29, %s2982_s21 }
 0x582   : > { %v1006_v28 = vpop.xlane.xlu1 %1005 }
 0x583   : > { %v1010_v32 = vsub.f32 %v1001_v17, %v1006_v28 }
 0x585   : > { %v1012_v33 = vmul.f32 1.442695, %v1010_v32 }
 0x587   : > { %2940 = vpow2.f32 %v1012_v33 }
 0x58a   : > { %v1009_v41 = vpop.xlane.xlu0 %1008 }
 0x58b   : > { %v1011_v42 = vsub.f32 %v1002_v24, %v1009_v41 }
 0x58d   : > { %v1014_v43 = vmul.f32 1.442695, %v1011_v42 }
 0x58e   : > { %v785_v55 = vpop.permute.xlu0 %784 }
 0x58f   : > { %2942 = vpow2.f32 %v1014_v43  ;;  %v803_v48 = vcombine.high %v785_v55, %v2975_v30  ;;  %v810_v51 = vrot.slane %v785_v55, %v3144_v62 }
 0x591   : > { %v2941_v35 = vpop.eup %2940 }
 0x592   : > { %v1016_v40 = vsel %vm1003_vm5, %v2941_v35, 0.0 }
 0x593   : > { %1017 = vadd.xlane.f32.xlu1 %v1016_v40  ;;  %v1246_v40 = vpop.permute.xlu0 %1245 }
 0x599   : > { %v2943_v44 = vpop.eup %2942 }
 0x59a   : > { %v1019_v45 = vsel %vm1003_vm5, %v2943_v44, 0.0 }
 0x5a4   : > { %782 = vrot.lane.b32.xlu1 %v3130_v50, %s2981_s20  ;;  %v817_v50 = vrot.slane %v803_v48, %v3144_v62 }
 0x5c8   : > { %1020 = vadd.xlane.f32.xlu1 %v1019_v45 }
 0x620   : > { %v1018_v46 = vpop.xlane.xlu1 %1017 }
 0x621   : > { %2944 = vrcp.f32 %v1018_v46 }
 0x624   : > { %v783_v49 = vpop.permute.xlu1 %782 }
 0x625   : > { %v788_v52 = vcombine.high %v783_v49, %v2975_v30  ;;  %v795_v53 = vrot.slane %v783_v49, %v3144_v62 }
 0x627   : > { %v802_v54 = vrot.slane %v788_v52, %v3144_v62  ;;  %v818_v56 = vcombine.low %v795_v53, %v810_v51  ;;  %v819_v57 = vcombine.high %v795_v53, %v810_v51 }
 0x629   : > { %v826_v58 = vrot.slane %v818_v56, %v3153_v10  ;;  %v833_v59 = vrot.slane %v819_v57, %v3153_v10  ;;  %v834_v60 = vcombine.low %v802_v54, %v817_v50  ;;  %v835_v61 = vcombine.high %v802_v54, %v817_v50 }
 0x62b   : > { %v842_v63 = vrot.slane %v834_v60, %v3153_v10  ;;  %v849_v0 = vrot.slane %v835_v61, %v3153_v10  ;;  %v854_v1 = vcombine.low %v826_v58, %v833_v59  ;;  %v2621_v2 = vcombine.high %v826_v58, %v833_v59  ;;  %v2945_v14 = vpop.eup %2944 }
 0x62c   : > { %v1024_v18 = vmul.f32 %v2945_v14, %v2941_v35 }
 0x62d   : > { %v861_v3 = vrot.slane %v854_v1, %v3144_v62  ;;  %v869_v4 = vrot.slane %v2621_v2, %v3144_v62  ;;  %v870_v5 = vcombine.low %v842_v63, %v849_v0  ;;  %v2622_v6 = vcombine.high %v842_v63, %v849_v0 }
 0x62e   : > { %v1026_v23 = vpack.c.bf16 %v1024_v18, %v1024_v18 }
 0x62f   : > { %v877_v7 = vrot.slane %v870_v5, %v3144_v62  ;;  %v885_v8 = vrot.slane %v2622_v6, %v3144_v62  ;;  %v886_v9 = vcombine.low %v861_v3, %v869_v4 }
 0x631   : > { %v894_v11 = vcombine.low %v877_v7, %v885_v8  ;;  %v893_v12 = vrot.slane %v886_v9, %v3153_v10 }
 0x633   : > { %v901_v13 = vrot.slane %v894_v11, %v3153_v10 }
 0x635   : > { %v902_v16 = vcombine.low %v893_v12, %v901_v13  ;;  %v903_v17 = vcombine.high %v893_v12, %v901_v13 }
 0x637   : > { %v1028_v20 = vpack.c.bf16 %v902_v16, %v902_v16  ;;  %v1029_v22 = vpack.c.bf16 %v903_v17, %v903_v17  ;;  %v1297_v16 = vsub.s32 3, %v3108_v36 }
 0x639   : > { %v1035_v21 = vsel %vm1033_vm6, %v1028_v20, 0  ;;  %v1081_v24 = vsel %vm1033_vm6, %v1029_v22, 0  ;;  %v1298_v17 = vrot.slane %v3114_v38, %v1297_v16 }
 0x63a   : > { %2769 = vmatpush3.bf16.msra.mxu1 %v1035_v21 }
 0x63b   : > { %2774 = vmatprep.subr.bf16.mxu1 %v2975_v30 }
 0x63d   : > { %2771 = vmatmul.mubr.msk.bf16.vlgmr.msra.gmra.mrb[12].mxu1 %vm1003_vm5, %v1026_v23 }
 0x63e   : > { %2775 = vmatpush3.bf16.msra.mxu1 %v1081_v24  ;;  %2776 = vmatprep.mubr.msk.bf16.mxu1 %vm2976_vm2, %v2975_v30 }
 0x63f   : > { %2780 = vmatprep.subr.bf16.mxu1 %v2975_v30 }
 0x655   : > { %v1021_v25 = vpop.xlane.xlu1 %1020 }
 0x656   : > { %2946 = vrcp.f32 %v1021_v25 }
 0x660   : > { %v2947_v34 = vpop.eup %2946 }
 0x661   : > { %v1025_v26 = vmul.f32 %v2947_v34, %v2943_v44 }
 0x663   : > { %v1027_v27 = vpack.c.bf16 %v1025_v26, %v1025_v26 }
 0x665   : > { %2777 = vmatmul.mubr.msk.bf16.vlgmr.msra.gmra.mrb[16].mxu1 %vm1003_vm5, %v1027_v27 }
 0x666   : > { %2784 = vmatprep.mubr.msk.bf16.mxu1 %vm2976_vm2, %v2975_v30  ;;  %2781 = vmatpush3.bf16.msra.mxu1 %v1246_v40 }
 0x667   : > { %2782 = vmatprep.subr.bf16.mxu1 %v2975_v30 }
 0x710   : > { %v1071_v28 = vpop.f32.mrb[12].mxu1 }
 0x711   : > { %v2772_v32 = vpop.f32.mrb[13].mxu1  ;;  %v1123_v41 = vcombine.high %v1071_v28, %v2975_v30  ;;  %v1130_v43 = vrot.slane %v1071_v28, %v3144_v62 }
 0x712   : > { %v1074_v33 = vpop.f32.mrb[14].mxu1  ;;  %v2917_v32 = vld [vmem:[%s3563_s5 + $0x8] sm:$0xff]  }
 0x713   : > { %v2773_v35 = vpop.f32.mrb[15].mxu1  ;;  %v1137_v29 = vrot.slane %v1123_v41, %v3144_v62  ;;  %v1315_v41 = vsub.s32 4, %v3108_v36 }
 0x738   : > { %v1117_v42 = vpop.f32.mrb[16].mxu1 }
 0x739   : > { %v1138_v44 = vcombine.high %v1117_v42, %v2975_v30  ;;  %v1145_v45 = vrot.slane %v1117_v42, %v3144_v62  ;;  %v2778_v55 = vpop.f32.mrb[17].mxu1  ;;  %v1320_v42 = vsub.s32 5, %v3108_v36 }
 0x73a   : > { %v1120_v46 = vpop.f32.mrb[18].mxu1 }
 0x73b   : > { %v1152_v48 = vrot.slane %v1138_v44, %v3144_v62  ;;  %v1153_v49 = vcombine.low %v1130_v43, %v1145_v45  ;;  %v1154_v51 = vcombine.high %v1130_v43, %v1145_v45  ;;  %v2779_v52 = vpop.f32.mrb[19].mxu1  ;;  %v1316_v43 = vrot.slane %v3114_v38, %v1315_v41 }
 0x73c   : > { %v1321_v55 = vrot.slane %v3114_v38, %v1320_v42  ;;  %v2920_v52 = vld [vmem:[%s3564_s6 + $0x10] sm:$0xff]  }
 0x73d   : > { %v1161_v53 = vrot.slane %v1153_v49, %v3153_v10  ;;  %v1168_v50 = vrot.slane %v1154_v51, %v3153_v10  ;;  %v1169_v54 = vcombine.low %v1137_v29, %v1152_v48  ;;  %v1170_v56 = vcombine.high %v1137_v29, %v1152_v48  ;;  %v2918_v48 = vld [vmem:[%s3564_s6] sm:$0xff]   ;;  %v2919_v51 = vld [vmem:[%s3564_s6 + $0x8] sm:$0xff]  }
 0x73f   : > { %v1177_v57 = vrot.slane %v1169_v54, %v3153_v10  ;;  %v1184_v58 = vrot.slane %v1170_v56, %v3153_v10  ;;  %v1189_v59 = vcombine.low %v1161_v53, %v1168_v50  ;;  %v2627_v60 = vcombine.high %v1161_v53, %v1168_v50  ;;  %v2921_v53 = vld [vmem:[%s3564_s6 + $0x18] sm:$0xff]   ;;  %v2922_v50 = vld [vmem:[%s3564_s6 + $0x20] sm:$0xff]   ;;  %v2923_v54 = vld [vmem:[%s3564_s6 + $0x28] sm:$0xff]  }
 0x740   : > { %v2924_v56 = vld [vmem:[%s3564_s6 + $0x30] sm:$0xff]  }
 0x741   : > { %v1196_v61 = vrot.slane %v1189_v59, %v3144_v62  ;;  %v1204_v63 = vrot.slane %v2627_v60, %v3144_v62  ;;  %v1205_v0 = vcombine.low %v1177_v57, %v1184_v58  ;;  %v2628_v1 = vcombine.high %v1177_v57, %v1184_v58  ;;  %v2925_v57 = vld [vmem:[%s3564_s6 + $0x38] sm:$0xff]  }
 0x742   : > { %v1326_v58 = vsub.s32 6, %v3108_v36 }
 0x743   : > { %v1212_v2 = vrot.slane %v1205_v0, %v3144_v62  ;;  %v1220_v3 = vrot.slane %v2628_v1, %v3144_v62  ;;  %v1221_v4 = vcombine.low %v1196_v61, %v1204_v63 }
 0x744   : > { %v1327_v59 = vrot.slane %v3114_v38, %v1326_v58 }
 0x745   : > { %v1229_v5 = vcombine.low %v1212_v2, %v1220_v3  ;;  %v1228_v6 = vrot.slane %v1221_v4, %v3153_v10 }
 0x747   : > { %v1236_v7 = vrot.slane %v1229_v5, %v3153_v10 }
 0x749   : > { %v1238_v8 = vcombine.high %v1228_v6, %v1236_v7  ;;  %v1237_v9 = vcombine.low %v1228_v6, %v1236_v7 }
 0x74b   : > { %1240 = vrot.lane.b32.xlu0 %v1238_v8, %s2983_s22  ;;  %v1480_v8 = vsub.s32 7, %v3108_v36 }
 0x74f   : > { %1247 = vrot.lane.b32.xlu0 %v3099_v31, %s2982_s21 }
 0x7bd   : > { %v1241_v11 = vpop.permute.xlu0 %1240 }
 0x7be   : > { %v1243_v12 = vsel %vm908_vm3, %v1237_v9, %v1241_v11  ;;  %v1481_v9 = vrot.slane %v3114_v38, %v1480_v8  ;;  %v3341_v38 = vld [vmem:[%s3562_s4 + $0x10] sm:$0xff]  }
 0x7bf   : > { %v1244_v14 = vpack.c.bf16 %v1243_v12, %v1243_v12 }
 0x7c1   : > { %v1248_v13 = vpop.permute.xlu0 %1247 }
 0x7c2   : > { %2783 = vmatpush3.bf16.msra.mxu1 %v1248_v13 }
 0x7c3   : > { %2788 = vmatprep.subr.bf16.mxu1 %v2975_v30 }
 0x7c5   : > { %2785 = vmatmul.mubr.msk.bf16.vlgmr.msra.gmra.mrb[20].mxu1 %vm451_vm1, %v1244_v14 }
 0x7c6   : > { %2792 = vmatprep.mubr.msk.bf16.mxu1 %vm2976_vm2, %v2975_v30 }
 0x898   : > { %v1288_v31 = vpop.f32.mrb[20].mxu1 }
 0x899   : > { %v1294_v18 = vadd.f32 %v1288_v31, %v3081_v19  ;;  %v2786_v20 = vpop.f32.mrb[21].mxu1  ;;  %v2916_v19 = vld [vmem:[%s3563_s5] sm:$0xff]  }
 0x89a   : > { %v1291_v21 = vpop.f32.mrb[22].mxu1  ;;  %2789 = vmatpush3.bf16.msra.mxu1 %v2916_v19 }
 0x89b   : > { %v3264_v22 = vadd.f32 %v1298_v17, %v1294_v18  ;;  %v2787_v23 = vpop.f32.mrb[23].mxu1  ;;  %2790 = vmatprep.subr.bf16.mxu1 %v2975_v30 }
 0x89d   : > { %v1300_v24 = vsel %vm451_vm1, %v3264_v22, 0.0 }
 0x89e   : > { %1301 = vadd.xlane.f32.xlu0 %v1300_v24  ;;  %2791 = vmatpush3.bf16.msra.mxu1 %v2917_v32 }
 0x89f   : > { %2796 = vmatprep.subr.bf16.mxu1 %v2975_v30 }
 0x92b   : > { %v1302_v25 = vpop.xlane.xlu0 %1301 }
 0x92c   : > { %v1303_v34 = vmul.f32 0.03125, %v1302_v25 }
 0x92e   : > { %v1304_v26 = vsub.f32 %v3264_v22, %v1303_v34 }
 0x930   : > { %v1305_v27 = vmul.f32 %v1304_v26, %v1304_v26 }
 0x932   : > { %v1306_v28 = vsel %vm451_vm1, %v1305_v27, 0.0 }
 0x933   : > { %1307 = vadd.xlane.f32.xlu1 %v1306_v28  ;;  %v3355_v28 = vld [vmem:[%s3561_s3 + $0x8] sm:$0xff] }
 0x934   : > { %v1528_v19 = vrot.slane %v3355_v28, %v468_v37 }
 0x9c0   : > { %v1308_v33 = vpop.xlane.xlu1 %1307 }
 0x9c1   : > { %v1309_v35 = vmul.f32 0.03125, %v1308_v33  ;;  %v1533_v33 = vrot.slane %v3355_v28, %v473_v39 }
 0x9c3   : > { %v1310_v40 = vadd.f32 1e-06, %v1309_v35 }
 0x9c5   : > { %2948 = vrsqrt.f32 %v1310_v40 }
 0x9cf   : > { %v2949_v44 = vpop.eup %2948 }
 0x9d0   : > { %v1312_v45 = vmul.f32 %v2949_v44, %v1304_v26 }
 0x9d2   : > { %v1317_v46 = vmul.f32 %v1316_v43, %v1312_v45  ;;  %v1539_v45 = vrot.slane %v3355_v28, %v479_v47 }
 0x9d4   : > { %v1322_v29 = vadd.f32 %v1321_v55, %v1317_v46 }
 0x9d6   : > { %v1323_v49 = vpack.c.bf16 %v1322_v29, %v1322_v29 }
 0x9d8   : > { %2793 = vmatmul.mubr.msk.bf16.vlgmr.msra.gmra.mrb[24].mxu1 %vm451_vm1, %v1323_v49 }
 0x9d9   : > { %2797 = vmatpush3.bf16.msra.mxu1 %v2918_v48  ;;  %2812 = vmatprep.mubr.msk.bf16.mxu1 %vm2976_vm2, %v2975_v30 }
 0x9da   : > { %2798 = vmatprep.subr.bf16.mxu1 %v2975_v30 }
 0x9dd   : > { %2799 = vmatpush3.bf16.msra.mxu1 %v2919_v51 }
 0x9de   : > { %2800 = vmatprep.subr.bf16.mxu1 %v2975_v30 }
 0x9e1   : > { %2801 = vmatpush3.bf16.msra.mxu1 %v2920_v52 }
 0x9e2   : > { %2802 = vmatprep.subr.bf16.mxu1 %v2975_v30 }
 0x9e5   : > { %2803 = vmatpush3.bf16.msra.mxu1 %v2921_v53 }
 0x9e6   : > { %2804 = vmatprep.subr.bf16.mxu1 %v2975_v30 }
 0x9e9   : > { %2805 = vmatpush3.bf16.msra.mxu1 %v2922_v50 }
 0x9ea   : > { %2806 = vmatprep.subr.bf16.mxu1 %v2975_v30 }
 0x9ed   : > { %2807 = vmatpush3.bf16.msra.mxu1 %v2923_v54 }
 0x9ee   : > { %2808 = vmatprep.subr.bf16.mxu1 %v2975_v30 }
 0x9f1   : > { %2809 = vmatpush3.bf16.msra.mxu1 %v2924_v56 }
 0x9f2   : > { %2810 = vmatprep.subr.bf16.mxu1 %v2975_v30 }
 0x9f5   : > { %2811 = vmatpush3.bf16.msra.mxu1 %v2925_v57 }
 0x9f6   : > { %2816 = vmatprep.subr.bf16.mxu1 %v2975_v30 }
 0xaab   : > { %v1377_v60 = vpop.f32.mrb[24].mxu1 }
 0xaac   : > { %v1378_v61 = vadd.f32 %v1377_v60, %v1327_v59  ;;  %v2794_v63 = vpop.f32.mrb[25].mxu1 }
 0xaad   : > { %v1380_v0 = vpop.f32.mrb[26].mxu1 }
 0xaae   : > { %v1384_v1 = vmul.f32 0.70710677, %v1378_v61  ;;  %v2795_v2 = vpop.f32.mrb[27].mxu1  ;;  %v1383_v4 = vmul.f32 0.5, %v1378_v61 }
 0xab0   : > { %2950 = verf.f32 %v1384_v1 }
 0xaba   : > { %v2951_v3 = vpop.eup %2950 }
 0xabb   : > { %v1386_v5 = vadd.f32 1.0, %v2951_v3 }
 0xabd   : > { %v1387_v6 = vmul.f32 %v1386_v5, %v1383_v4 }
 0xabf   : > { %v1388_v7 = vpack.c.bf16 %v1387_v6, %v1387_v6 }
 0xac1   : > { %2813 = vmatmul.mubr.bf16.vlgmr.msra.gmra.mrb[28].mxu1 %v1388_v7 }
 0xac2   : > { %2820 = vmatprep.mubr.msk.bf16.mxu1 %vm2976_vm2, %v2975_v30  ;;  %2817 = vmatpush3.bf16.msra.mxu1 %v3341_v38 }
 0xac3   : > { %2818 = vmatprep.subr.bf16.mxu1 %v2975_v30 }
 0xb94   : > { %v1471_v11 = vpop.f32.mrb[28].mxu1 }
 0xb95   : > { %v1477_v12 = vadd.f32 %v1471_v11, %v3264_v22  ;;  %v2814_v13 = vpop.f32.mrb[29].mxu1  ;;  %v3347_v22 = vld [vmem:[%s3562_s4 + $0x18] sm:$0xff]  }
 0xb96   : > { %v1474_v14 = vpop.f32.mrb[30].mxu1  ;;  %2819 = vmatpush3.bf16.msra.mxu1 %v3347_v22 }
 0xb97   : > { %v3332_v17 = vadd.f32 %v1481_v9, %v1477_v12  ;;  %v2815_v31 = vpop.f32.mrb[31].mxu1  ;;  %2842 = vmatprep.subr.bf16.mxu1 %v2975_v30 }
 0xb99   : > { %v1512_v18 = vsel %vm451_vm1, %v3332_v17, 0.0 }
 0xb9a   : > { %1513 = vadd.xlane.f32.xlu1 %v1512_v18 }
 0xc27   : > { %v1514_v20 = vpop.xlane.xlu1 %1513 }
 0xc28   : > { %v1515_v21 = vmul.f32 0.03125, %v1514_v20 }
 0xc2a   : > { %v1516_v23 = vsub.f32 %v3332_v17, %v1515_v21 }
 0xc2c   : > { %v1517_v24 = vmul.f32 %v1516_v23, %v1516_v23 }
 0xc2e   : > { %v1518_v25 = vsel %vm451_vm1, %v1517_v24, 0.0 }
 0xc2f   : > { %1519 = vadd.xlane.f32.xlu1 %v1518_v25 }
 0xcbc   : > { %v1520_v34 = vpop.xlane.xlu1 %1519 }
 0xcbd   : > { %v1521_v26 = vmul.f32 0.03125, %v1520_v34 }
 0xcbf   : > { %v1522_v27 = vadd.f32 1e-06, %v1521_v26 }
 0xcc1   : > { %2952 = vrsqrt.f32 %v1522_v27 }
 0xccb   : > { %v2953_v32 = vpop.eup %2952 }
 0xccc   : > { %v1524_v35 = vmul.f32 %v2953_v32, %v1516_v23 }
 0xcce   : > { %v1529_v40 = vmul.f32 %v1528_v19, %v1524_v35 }
 0xcd0   : > { %v1534_v43 = vadd.f32 %v1533_v33, %v1529_v40 }
 0xcd2   : > { %v1535_v44 = vpack.c.bf16 %v1534_v43, %v1534_v43 }
 0xcd4   : > { %2821 = vmatmul.mubr.msk.bf16.vlgmr.msra.gmra.mrb[32].mxu1 %vm451_vm1, %v1535_v44 }
 0xcd5   : > { %2844 = vmatprep.mubr.msk.bf16.mxu1 %vm2976_vm2, %v2975_v30 }
 0xda7   : > { %v1589_v55 = vpop.f32.mrb[32].mxu1 }
 0xda8   : > { %v3369_v37 = vadd.f32 %v1589_v55, %v1539_v45  ;;  %v2822_v46 = vpop.f32.mrb[33].mxu1 }
 0xda9   : > { %v1592_v29 = vpop.f32.mrb[34].mxu1 }
 0xdaa   : > { %1719 = vrot.lane.b32.xlu0 %v3369_v37, %s2978_s19  ;;  %1717 = vrot.lane.b32.xlu1 %v3369_v37, %s2977_s18  ;;  %v2823_v39 = vpop.f32.mrb[35].mxu1  ;;  %v1595_v49 = vmul.f32 0.25, %v3369_v37 }
 0xdac   : > { %v1600_v61 = vcombine.high %v1595_v49, %v2975_v30  ;;  %v1607_v4 = vrot.slane %v1595_v49, %v3144_v62 }
 0xdae   : > { %v1614_v13 = vrot.slane %v1600_v61, %v3144_v62 }
 0xe1c   : > { %v3375_v48 = vpop.permute.xlu1 %1717  ;;  %v1720_v47 = vpop.permute.xlu0 %1719 }
 0xe1d   : > { %1721 = vrot.lane.b32.xlu1 %v3375_v48, %s2978_s19  ;;  %v1725_v51 = vcombine.high %v1720_v47, %v2975_v30  ;;  %v1732_v53 = vrot.slane %v1720_v47, %v3144_v62 }
 0xe1f   : > { %v1739_v56 = vrot.slane %v1725_v51, %v3144_v62 }
 0xe21   : > { %1597 = vrot.lane.b32.xlu1 %v1595_v49, %s2977_s18 }
 0xe8f   : > { %v1722_v52 = vpop.permute.xlu1 %1721 }
 0xe90   : > { %v1740_v50 = vcombine.high %v1722_v52, %v2975_v30  ;;  %v1747_v54 = vrot.slane %v1722_v52, %v3144_v62 }
 0xe92   : > { %v1754_v57 = vrot.slane %v1740_v50, %v3144_v62  ;;  %v1755_v59 = vcombine.low %v1732_v53, %v1747_v54  ;;  %v1756_v60 = vcombine.high %v1732_v53, %v1747_v54 }
 0xe93   : > { %v1598_v63 = vpop.permute.xlu1 %1597 }
 0xe94   : > { %v1763_v0 = vrot.slane %v1755_v59, %v3153_v10  ;;  %v1770_v1 = vrot.slane %v1756_v60, %v3153_v10  ;;  %v1771_v2 = vcombine.low %v1739_v56, %v1754_v57  ;;  %v1772_v3 = vcombine.high %v1739_v56, %v1754_v57 }
 0xe95   : > { %v1615_v5 = vcombine.high %v1598_v63, %v2975_v30  ;;  %v1622_v6 = vrot.slane %v1598_v63, %v3144_v62 }
 0xe96   : > { %v1779_v7 = vrot.slane %v1771_v2, %v3153_v10  ;;  %v1786_v9 = vrot.slane %v1772_v3, %v3153_v10  ;;  %v1791_v11 = vcombine.low %v1763_v0, %v1770_v1  ;;  %v2671_v12 = vcombine.high %v1763_v0, %v1770_v1 }
 0xe97   : > { %v1629_v14 = vrot.slane %v1615_v5, %v3144_v62  ;;  %v1630_v31 = vcombine.low %v1607_v4, %v1622_v6  ;;  %v1631_v18 = vcombine.high %v1607_v4, %v1622_v6 }
 0xe98   : > { %v1798_v20 = vrot.slane %v1791_v11, %v3144_v62  ;;  %v1806_v21 = vrot.slane %v2671_v12, %v3144_v62  ;;  %v1807_v23 = vcombine.low %v1779_v7, %v1786_v9  ;;  %v2672_v24 = vcombine.high %v1779_v7, %v1786_v9 }
 0xe99   : > { %v1638_v25 = vrot.slane %v1630_v31, %v3153_v10  ;;  %v1645_v34 = vrot.slane %v1631_v18, %v3153_v10  ;;  %v1646_v26 = vcombine.low %v1614_v13, %v1629_v14  ;;  %v1647_v27 = vcombine.high %v1614_v13, %v1629_v14 }
 0xe9a   : > { %v1814_v19 = vrot.slane %v1807_v23, %v3144_v62  ;;  %v1822_v32 = vrot.slane %v2672_v24, %v3144_v62  ;;  %v1823_v33 = vcombine.low %v1798_v20, %v1806_v21 }
 0xe9b   : > { %v1654_v35 = vrot.slane %v1646_v26, %v3153_v10  ;;  %v1661_v40 = vrot.slane %v1647_v27, %v3153_v10  ;;  %v1666_v43 = vcombine.low %v1638_v25, %v1645_v34  ;;  %v2669_v44 = vcombine.high %v1638_v25, %v1645_v34 }
 0xe9c   : > { %v1831_v45 = vcombine.low %v1814_v19, %v1822_v32  ;;  %v1830_v49 = vrot.slane %v1823_v33, %v3153_v10 }
 0xe9d   : > { %v1673_v55 = vrot.slane %v1666_v43, %v3144_v62  ;;  %v1681_v46 = vrot.slane %v2669_v44, %v3144_v62  ;;  %v1682_v29 = vcombine.low %v1654_v35, %v1661_v40  ;;  %v2670_v39 = vcombine.high %v1654_v35, %v1661_v40 }
 0xe9e   : > { %v1838_v47 = vrot.slane %v1831_v45, %v3153_v10 }
 0xe9f   : > { %v1689_v51 = vrot.slane %v1682_v29, %v3144_v62  ;;  %v1697_v52 = vrot.slane %v2670_v39, %v3144_v62  ;;  %v1698_v53 = vcombine.low %v1673_v55, %v1681_v46 }
 0xea0   : > { %v1839_v50 = vcombine.low %v1830_v49, %v1838_v47  ;;  %v1840_v61 = vcombine.high %v1830_v49, %v1838_v47 }
 0xea1   : > { %v1706_v54 = vcombine.low %v1689_v51, %v1697_v52  ;;  %v1705_v59 = vrot.slane %v1698_v53, %v3153_v10 }
 0xea2   : > { %v1965_v56 = vpack.c.bf16 %v1839_v50, %v1839_v50  ;;  %v1966_v0 = vpack.c.bf16 %v1840_v61, %v1840_v61 }
 0xea3   : > { %v1713_v57 = vrot.slane %v1706_v54, %v3153_v10 }
 0xea4   : > { %v1971_v60 = vsel %vm908_vm3, %v1965_v56, 0  ;;  %v2017_v2 = vsel %vm908_vm3, %v1966_v0, 0 }
 0xea5   : > { %2825 = vmatpush3.bf16.xpose.msra.mxu0 %v1971_v60  ;;  %v1714_v63 = vcombine.low %v1705_v59, %v1713_v57  ;;  %v1715_v3 = vcombine.high %v1705_v59, %v1713_v57 }
 0xea6   : > { %2830 = vmatprep.subr.bf16.mxu0 %v2975_v30 }
 0xea7   : > { %v1963_v1 = vpack.c.bf16 %v1714_v63, %v1714_v63  ;;  %v1964_v4 = vpack.c.bf16 %v1715_v3, %v1715_v3 }
 0xeac   : > { %2827 = vmatmul.mubr.msk.bf16.vlgmr.msra.gmra.mrb[4].mxu0 %vm908_vm3, %v1963_v1 }
 0xead   : > { %2831 = vmatpush3.bf16.xpose.msra.mxu0 %v2017_v2  ;;  %2832 = vmatprep.mubr.msk.bf16.mxu0 %vm2976_vm2, %v2975_v30 }
 0xeae   : > { %2836 = vmatprep.subr.bf16.mxu0 %v2975_v30 }
 0xeb4   : > { %2833 = vmatmul.mubr.msk.bf16.vlgmr.msra.gmra.mrb[8].mxu0 %vm908_vm3, %v1964_v4 }
 0xeb5   : > { %2838 = vmatprep.mubr.msk.bf16.mxu0 %vm2976_vm2, %v2975_v30 }
 0xf7f   : > { %v2007_v5 = vpop.f32.mrb[4].mxu0 }
 0xf80   : > { %v2059_v6 = vsel %vm425_vm4, %v2007_v5, -1e+30  ;;  %v2828_v7 = vpop.f32.mrb[5].mxu0 }
 0xf81   : > { %v2010_v9 = vpop.f32.mrb[6].mxu0  ;;  %v2061_v11 = vsel %vm1003_vm5, %v2059_v6, -inf }
 0xf82   : > { %2062 = vmax.xlane.f32.xlu1 %v2061_v11  ;;  %v2829_v12 = vpop.f32.mrb[7].mxu0 }
 0xf87   : > { %v2053_v13 = vpop.f32.mrb[8].mxu0 }
 0xf88   : > { %v2060_v14 = vsel %vm425_vm4, %v2053_v13, -1e+30  ;;  %v2834_v31 = vpop.f32.mrb[9].mxu0 }
 0xf89   : > { %v2056_v18 = vpop.f32.mrb[10].mxu0  ;;  %v2064_v20 = vsel %vm1003_vm5, %v2060_v14, -inf }
 0xf8a   : > { %2065 = vmax.xlane.f32.xlu0 %v2064_v20  ;;  %v2835_v21 = vpop.f32.mrb[11].mxu0 }
0x100f   : > { %v2063_v23 = vpop.xlane.xlu1 %2062 }
0x1010   : > { %v2067_v24 = vsub.f32 %v2059_v6, %v2063_v23 }
0x1012   : > { %v2069_v25 = vmul.f32 1.442695, %v2067_v24 }
0x1014   : > { %2954 = vpow2.f32 %v2069_v25 }
0x1017   : > { %v2066_v34 = vpop.xlane.xlu0 %2065 }
0x1018   : > { %v2068_v26 = vsub.f32 %v2060_v14, %v2066_v34 }
0x101a   : > { %v2071_v27 = vmul.f32 1.442695, %v2068_v26 }
0x101c   : > { %2956 = vpow2.f32 %v2071_v27 }
0x101e   : > { %v2955_v19 = vpop.eup %2954 }
0x101f   : > { %v2073_v32 = vsel %vm1003_vm5, %v2955_v19, 0.0 }
0x1020   : > { %2074 = vadd.xlane.f32.xlu1 %v2073_v32 }
0x1026   : > { %v2957_v15 = vpop.eup %2956 }
0x1027   : > { %v2076_v33 = vsel %vm1003_vm5, %v2957_v15, 0.0 }
0x1028   : > { %2077 = vadd.xlane.f32.xlu0 %v2076_v33 }
0x1031   : > { %1841 = vrot.lane.b32.xlu1 %v3369_v37, %s2981_s20 }
0x1035   : > { %2301 = vrot.lane.b32.xlu1 %v3341_v38, %s2982_s21 }
0x103e   : > { %1843 = vrot.lane.b32.xlu0 %v3375_v48, %s2981_s20  ;;  %s276_s20 = scalar_lea.vmem %s3565_s7, %s2600_s11 }
0x1042   : > { %2303 = vrot.lane.b32.xlu0 %v3347_v22, %s2982_s21 }
0x10ad   : > { %v2075_v35 = vpop.xlane.xlu1 %2074 }
0x10ae   : > { %2958 = vrcp.f32 %v2075_v35 }
0x10b1   : > { %v1842_v40 = vpop.permute.xlu1 %1841 }
0x10b2   : > { %v1847_v44 = vcombine.high %v1842_v40, %v2975_v30  ;;  %v1854_v55 = vrot.slane %v1842_v40, %v3144_v62 }
0x10b4   : > { %v1861_v38 = vrot.slane %v1847_v44, %v3144_v62 }
0x10b5   : > { %v2078_v43 = vpop.xlane.xlu0 %2077  ;;  %v2302_v21 = vpop.permute.xlu1 %2301 }
0x10b6   : > { %2960 = vrcp.f32 %v2078_v43 }
0x10b8   : > { %v2959_v2 = vpop.eup %2958 }
0x10b9   : > { %v1844_v45 = vpop.permute.xlu0 %1843  ;;  %v2081_v9 = vmul.f32 %v2959_v2, %v2955_v19 }
0x10ba   : > { %v1862_v46 = vcombine.high %v1844_v45, %v2975_v30  ;;  %v1869_v37 = vrot.slane %v1844_v45, %v3144_v62 }
0x10bb   : > { %v2083_v18 = vpack.c.bf16 %v2081_v9, %v2081_v9 }
0x10bc   : > { %v1876_v29 = vrot.slane %v1862_v46, %v3144_v62  ;;  %v1877_v48 = vcombine.low %v1854_v55, %v1869_v37  ;;  %v1878_v39 = vcombine.high %v1854_v55, %v1869_v37 }
0x10bd   : > { %v2304_v23 = vpop.permute.xlu0 %2303 }
0x10be   : > { %v1885_v22 = vrot.slane %v1877_v48, %v3153_v10  ;;  %v1892_v49 = vrot.slane %v1878_v39, %v3153_v10  ;;  %v1893_v47 = vcombine.low %v1861_v38, %v1876_v29  ;;  %v1894_v51 = vcombine.high %v1861_v38, %v1876_v29 }
0x10c0   : > { %v1901_v52 = vrot.slane %v1893_v47, %v3153_v10  ;;  %v1908_v53 = vrot.slane %v1894_v51, %v3153_v10  ;;  %v1913_v50 = vcombine.low %v1885_v22, %v1892_v49  ;;  %v2673_v54 = vcombine.high %v1885_v22, %v1892_v49  ;;  %v2961_v5 = vpop.eup %2960 }
0x10c1   : > { %v2082_v11 = vmul.f32 %v2961_v5, %v2957_v15 }
0x10c2   : > { %v1920_v56 = vrot.slane %v1913_v50, %v3144_v62  ;;  %v1928_v57 = vrot.slane %v2673_v54, %v3144_v62  ;;  %v1929_v59 = vcombine.low %v1901_v52, %v1908_v53  ;;  %v2674_v60 = vcombine.high %v1901_v52, %v1908_v53 }
0x10c3   : > { %v2084_v20 = vpack.c.bf16 %v2082_v11, %v2082_v11 }
0x10c4   : > { %v1936_v61 = vrot.slane %v1929_v59, %v3144_v62  ;;  %v1944_v63 = vrot.slane %v2674_v60, %v3144_v62  ;;  %v1945_v0 = vcombine.low %v1920_v56, %v1928_v57 }
0x10c6   : > { %v1953_v1 = vcombine.low %v1936_v61, %v1944_v63  ;;  %v1952_v3 = vrot.slane %v1945_v0, %v3153_v10 }
0x10c8   : > { %v1960_v4 = vrot.slane %v1953_v1, %v3153_v10 }
0x10ca   : > { %v1961_v6 = vcombine.low %v1952_v3, %v1960_v4  ;;  %v1962_v7 = vcombine.high %v1952_v3, %v1960_v4 }
0x10cc   : > { %v2085_v12 = vpack.c.bf16 %v1961_v6, %v1961_v6  ;;  %v2086_v13 = vpack.c.bf16 %v1962_v7, %v1962_v7 }
0x10ce   : > { %v2091_v14 = vsel %vm1033_vm6, %v2085_v12, 0  ;;  %v2137_v31 = vsel %vm1033_vm6, %v2086_v13, 0 }
0x10cf   : > { %2837 = vmatpush3.bf16.msra.mxu0 %v2091_v14  ;;  %2843 = vmatpush3.bf16.msra.mxu1 %v2137_v31 }
0x10d0   : > { %2848 = vmatprep.subr.bf16.mxu0 %v2975_v30  ;;  %2856 = vmatprep.subr.bf16.mxu1 %v2975_v30 }
0x10d2   : > { %2839 = vmatmul.mubr.msk.bf16.vlgmr.msra.gmra.mrb[12].mxu0 %vm1003_vm5, %v2083_v18  ;;  %2845 = vmatmul.mubr.msk.bf16.vlgmr.msra.gmra.mrb[36].mxu1 %vm1003_vm5, %v2084_v20  ;;  %v2930_v20 = vld [vmem:[%s3564_s6 + $0x40] sm:$0xff]  }
0x10d3   : > { %2852 = vmatprep.mubr.msk.bf16.mxu0 %vm2976_vm2, %v2975_v30  ;;  %2860 = vmatprep.mubr.msk.bf16.mxu1 %vm2976_vm2, %v2975_v30 }
0x10d4   : > { %2849 = vmatpush3.bf16.msra.mxu0 %v2302_v21  ;;  %v2931_v21 = vld [vmem:[%s3564_s6 + $0x48] sm:$0xff]  }
0x10d5   : > { %2850 = vmatprep.subr.bf16.mxu0 %v2975_v30 }
0x10d8   : > { %2851 = vmatpush3.bf16.msra.mxu0 %v2304_v23  ;;  %v2932_v23 = vld [vmem:[%s3564_s6 + $0x50] sm:$0xff]  }
0x10d9   : > { %2864 = vmatprep.subr.bf16.mxu0 %v2975_v30 }
0x11a5   : > { %v2127_v24 = vpop.f32.mrb[12].mxu0  ;;  %v2173_v25 = vpop.f32.mrb[36].mxu1 }
0x11a6   : > { %v2179_v34 = vcombine.high %v2127_v24, %v2975_v30  ;;  %v2186_v26 = vrot.slane %v2127_v24, %v3144_v62  ;;  %v2194_v27 = vcombine.high %v2173_v25, %v2975_v30  ;;  %v2201_v19 = vrot.slane %v2173_v25, %v3144_v62  ;;  %v2840_v32 = vpop.f32.mrb[13].mxu0  ;;  %v2846_v15 = vpop.f32.mrb[37].mxu1 }
0x11a7   : > { %v2130_v33 = vpop.f32.mrb[14].mxu0  ;;  %v2176_v35 = vpop.f32.mrb[38].mxu1  ;;  %v2377_v32 = vrot.slane %v3355_v28, %v1320_v42  ;;  %v2935_v42 = vld [vmem:[%s3564_s6 + $0x68] sm:$0xff]  }
0x11a8   : > { %v2193_v40 = vrot.slane %v2179_v34, %v3144_v62  ;;  %v2208_v43 = vrot.slane %v2194_v27, %v3144_v62  ;;  %v2209_v44 = vcombine.low %v2186_v26, %v2201_v19  ;;  %v2210_v45 = vcombine.high %v2186_v26, %v2201_v19  ;;  %v2841_v55 = vpop.f32.mrb[15].mxu0  ;;  %v2847_v46 = vpop.f32.mrb[39].mxu1 }
0x11a9   : > { %v2372_v26 = vrot.slane %v3355_v28, %v1315_v41  ;;  %v2934_v41 = vld [vmem:[%s3564_s6 + $0x60] sm:$0xff]  }
0x11aa   : > { %v2217_v37 = vrot.slane %v2209_v44, %v3153_v10  ;;  %v2224_v38 = vrot.slane %v2210_v45, %v3153_v10  ;;  %v2225_v29 = vcombine.low %v2193_v40, %v2208_v43  ;;  %v2226_v48 = vcombine.high %v2193_v40, %v2208_v43  ;;  %v2933_v40 = vld [vmem:[%s3564_s6 + $0x58] sm:$0xff]   ;;  %v2936_v43 = vld [vmem:[%s3564_s6 + $0x70] sm:$0xff]  }
0x11ab   : > { %v2937_v44 = vld [vmem:[%s3564_s6 + $0x78] sm:$0xff]   ;;  %v2383_v45 = vrot.slane %v3355_v28, %v1326_v58 }
0x11ac   : > { %v2233_v39 = vrot.slane %v2225_v29, %v3153_v10  ;;  %v2240_v22 = vrot.slane %v2226_v48, %v3153_v10  ;;  %v2245_v49 = vcombine.low %v2217_v37, %v2224_v38  ;;  %v2679_v47 = vcombine.high %v2217_v37, %v2224_v38 }
0x11ae   : > { %v2252_v51 = vrot.slane %v2245_v49, %v3144_v62  ;;  %v2260_v52 = vrot.slane %v2679_v47, %v3144_v62  ;;  %v2261_v53 = vcombine.low %v2233_v39, %v2240_v22  ;;  %v2680_v50 = vcombine.high %v2233_v39, %v2240_v22 }
0x11b0   : > { %v2268_v54 = vrot.slane %v2261_v53, %v3144_v62  ;;  %v2276_v56 = vrot.slane %v2680_v50, %v3144_v62  ;;  %v2277_v57 = vcombine.low %v2252_v51, %v2260_v52  ;;  %v2354_v62 = vrot.slane %v3355_v28, %v1297_v16  ;;  %v2928_v16 = vld [vmem:[%s3563_s5 + $0x10] sm:$0xff]  }
0x11b1   : > { %2857 = vmatpush3.bf16.msra.mxu1 %v2928_v16  ;;  %v2537_v51 = vrot.slane %v3355_v28, %v1480_v8 }
0x11b2   : > { %v2285_v59 = vcombine.low %v2268_v54, %v2276_v56  ;;  %v2284_v60 = vrot.slane %v2277_v57, %v3153_v10  ;;  %2858 = vmatprep.subr.bf16.mxu1 %v2975_v30 }
0x11b4   : > { %v2292_v61 = vrot.slane %v2285_v59, %v3153_v10 }
0x11b6   : > { %v2294_v63 = vcombine.high %v2284_v60, %v2292_v61  ;;  %v2293_v0 = vcombine.low %v2284_v60, %v2292_v61 }
0x11b8   : > { %2296 = vrot.lane.b32.xlu1 %v2294_v63, %s2983_s22 }
0x122a   : > { %v2297_v1 = vpop.permute.xlu1 %2296 }
0x122b   : > { %v2299_v2 = vsel %vm908_vm3, %v2293_v0, %v2297_v1 }
0x122c   : > { %v2300_v3 = vpack.c.bf16 %v2299_v2, %v2299_v2 }
0x122e   : > { %2853 = vmatmul.mubr.msk.bf16.vlgmr.msra.gmra.mrb[16].mxu0 %vm451_vm1, %v2300_v3 }
0x122f   : > { %2880 = vmatprep.mubr.msk.bf16.mxu0 %vm2976_vm2, %v2975_v30  ;;  %2865 = vmatpush3.bf16.msra.mxu0 %v2930_v20 }
0x1230   : > { %2866 = vmatprep.subr.bf16.mxu0 %v2975_v30 }
0x1233   : > { %2867 = vmatpush3.bf16.msra.mxu0 %v2931_v21 }
0x1234   : > { %2868 = vmatprep.subr.bf16.mxu0 %v2975_v30 }
0x1237   : > { %2869 = vmatpush3.bf16.msra.mxu0 %v2932_v23 }
0x1238   : > { %2870 = vmatprep.subr.bf16.mxu0 %v2975_v30 }
0x123b   : > { %2871 = vmatpush3.bf16.msra.mxu0 %v2933_v40 }
0x123c   : > { %2872 = vmatprep.subr.bf16.mxu0 %v2975_v30 }
0x123f   : > { %2873 = vmatpush3.bf16.msra.mxu0 %v2934_v41 }
0x1240   : > { %2874 = vmatprep.subr.bf16.mxu0 %v2975_v30 }
0x1243   : > { %2875 = vmatpush3.bf16.msra.mxu0 %v2935_v42 }
0x1244   : > { %2876 = vmatprep.subr.bf16.mxu0 %v2975_v30 }
0x1247   : > { %2877 = vmatpush3.bf16.msra.mxu0 %v2936_v43 }
0x1248   : > { %2878 = vmatprep.subr.bf16.mxu0 %v2975_v30 }
0x124b   : > { %2879 = vmatpush3.bf16.msra.mxu0 %v2937_v44 }
0x1301   : > { %v2344_v4 = vpop.f32.mrb[16].mxu0 }
0x1302   : > { %v2350_v10 = vadd.f32 %v2344_v4, %v3332_v17  ;;  %v2854_v5 = vpop.f32.mrb[17].mxu0  ;;  %v2929_v17 = vld [vmem:[%s3563_s5 + $0x18] sm:$0xff]  }
0x1303   : > { %v2347_v6 = vpop.f32.mrb[18].mxu0  ;;  %2859 = vmatpush3.bf16.msra.mxu1 %v2929_v17 }
0x1304   : > { %v3492_v7 = vadd.f32 %v2354_v62, %v2350_v10  ;;  %v2855_v9 = vpop.f32.mrb[19].mxu0 }
0x1306   : > { %v2356_v11 = vsel %vm451_vm1, %v3492_v7, 0.0 }
0x1307   : > { %2357 = vadd.xlane.f32.xlu1 %v2356_v11 }
0x1394   : > { %v2358_v12 = vpop.xlane.xlu1 %2357 }
0x1395   : > { %v2359_v13 = vmul.f32 0.03125, %v2358_v12 }
0x1397   : > { %v2360_v14 = vsub.f32 %v3492_v7, %v2359_v13 }
0x1399   : > { %v2361_v31 = vmul.f32 %v2360_v14, %v2360_v14 }
0x139b   : > { %v2362_v18 = vsel %vm451_vm1, %v2361_v31, 0.0 }
0x139c   : > { %2363 = vadd.xlane.f32.xlu0 %v2362_v18 }
0x1429   : > { %v2364_v24 = vpop.xlane.xlu0 %2363 }
0x142a   : > { %v2365_v25 = vmul.f32 0.03125, %v2364_v24 }
0x142c   : > { %v2366_v34 = vadd.f32 1e-06, %v2365_v25 }
0x142e   : > { %2962 = vrsqrt.f32 %v2366_v34 }
0x1438   : > { %v2963_v27 = vpop.eup %2962 }
0x1439   : > { %v2368_v19 = vmul.f32 %v2963_v27, %v2360_v14 }
0x143b   : > { %v2373_v15 = vmul.f32 %v2372_v26, %v2368_v19 }
0x143d   : > { %v2378_v33 = vadd.f32 %v2377_v32, %v2373_v15 }
0x143f   : > { %v2379_v35 = vpack.c.bf16 %v2378_v33, %v2378_v33 }
0x1441   : > { %2861 = vmatmul.mubr.msk.bf16.vlgmr.msra.gmra.mrb[40].mxu1 %vm451_vm1, %v2379_v35 }
0x1514   : > { %v2433_v55 = vpop.f32.mrb[40].mxu1 }
0x1515   : > { %v2434_v46 = vadd.f32 %v2433_v55, %v2383_v45  ;;  %v2862_v37 = vpop.f32.mrb[41].mxu1 }
0x1516   : > { %v2436_v38 = vpop.f32.mrb[42].mxu1 }
0x1517   : > { %v2440_v29 = vmul.f32 0.70710677, %v2434_v46  ;;  %v2863_v48 = vpop.f32.mrb[43].mxu1  ;;  %v2439_v22 = vmul.f32 0.5, %v2434_v46 }
0x1519   : > { %2964 = verf.f32 %v2440_v29 }
0x1523   : > { %v2965_v39 = vpop.eup %2964 }
0x1524   : > { %v2442_v30 = vadd.f32 1.0, %v2965_v39 }
0x1526   : > { %v2443_v49 = vmul.f32 %v2442_v30, %v2439_v22 }
0x1528   : > { %v2444_v47 = vpack.c.bf16 %v2443_v49, %v2443_v49 }
0x152a   : > { %2881 = vmatmul.mubr.bf16.vlgmr.msra.gmra.mrb[20].mxu0 %v2444_v47 }
0x15fd   : > { %v2527_v52 = vpop.f32.mrb[20].mxu0 }
0x15fe   : > { %v2533_v58 = vadd.f32 %v2527_v52, %v3492_v7  ;;  %v2882_v53 = vpop.f32.mrb[21].mxu0 }
0x15ff   : > { %v2530_v50 = vpop.f32.mrb[22].mxu0 }
0x1600   : > { %v2538_v54 = vadd.f32 %v2537_v51, %v2533_v58  ;;  %v2883_v56 = vpop.f32.mrb[23].mxu0 }
0x1602   : > { %2539 = vst.msk [vmem:[%s276_s20] sm:$0xff] %vm451_vm1, %v2538_v54 }
0x1603 PF: > { %s17_s24 = sadd.s32 1, %s2972_s24  }
0x1604   : > { %p14_p4 = scmp.ge.s32.totalorder %s17_s24, 4  }
0x1606   :  { %16 = sbr.rel (!%p14_p4) target bundleno = 1 (0x1), region = 82 }

</bundles_post_ra>
